<compile_context>
chip_gen: v7x
topology: tpu7x:2x2x1
jax: 0.10.0
libtpu: 0.0.40
codegen_flags: <defaults>
</compile_context>

<pallas_src>
import jax
import jax.numpy as jnp
from jax.experimental import pallas as pl
from jax.experimental.pallas import tpu as pltpu


LANE = 128     # lane width (last dim)
SUB = 8        # sublane width (second-to-last dim)


def _round_up(v, m):
    return (v + m - 1) // m * m


def _choose_row_tile(num_nodes, budget_bytes=8 * 1024 * 1024):
    """Largest row tile (multiple of 128, <=512) whose double-buffered
    (TM, N_pad) bf16 adjacency tile fits within `budget_bytes`, without
    padding the node count past its next 128-multiple."""
    n128 = _round_up(num_nodes, LANE)
    for tm in (512, 384, 256, 128):
        if tm > n128:
            continue
        n_pad = _round_up(num_nodes, tm)
        if 2 * tm * n_pad * 2 <= budget_bytes:
            return tm
    # TODO(synk): for graphs so large that even a 128-row adjacency tile blows
    # the VMEM budget, also tile the contraction (source-node) dimension.
    return LANE


# --------------------------------------------------------------------------
# Kernel.  Grid = (phase, node_row_tile).
#   phase 0: conv1 on row tile i  ->  h1 tile written to resident VMEM scratch
#   phase 1: conv2 on row tile i, pooled-sum accumulated; on the last tile the
#            fc1/fc2 epilogue runs and the (G_pad, 128) output is stored.
# --------------------------------------------------------------------------
def gnn_kernel(a_ref,          # (TM, N_pad)  bf16   adjacency row tile (dst rows)
               x_ref,          # (N_pad, F_pad) bf16 full node features (resident)
               p_ref,          # (G_pad, TM)  bf16   pool-matrix column tile
               w1_ref, b1_ref, # (2*F_pad, H_pad) bf16 , (1, H_pad) f32
               w2_ref, b2_ref, # (2*H_pad, H_pad) bf16 , (1, H_pad) f32
               wf1_ref, bf1_ref,  # (H_pad, H_pad) bf16 , (1, H_pad) f32
               wf2_ref, bf2_ref,  # (H_pad, O_pad) bf16 , (1, O_pad) f32
               out_ref,        # (G_pad, O_pad) f32
               h1_ref,         # scratch (N_pad, H_pad) bf16 : resident h1
               pool_acc_ref):  # scratch (G_pad, H_pad) f32  : pooled accumulator
    phase = pl.program_id(0)
    i = pl.program_id(1)
    n_tiles = pl.num_programs(1)
    tm = a_ref.shape[0]
    row0 = pl.multiple_of(i * tm, tm)

    # ---------------- phase 0: conv1 + ReLU on row tile i ----------------
    @pl.when(phase == 0)
    def _():
        a_tile = a_ref[...]                                  # (TM, N_pad) bf16
        x_full = x_ref[...]                                  # (N_pad, F_pad) bf16
        # neighbor sum for the tile's destination rows
        agg = jnp.dot(a_tile, x_full,
                      preferred_element_type=jnp.float32)    # (TM, F_pad) f32
        x_tile = x_ref[pl.ds(row0, tm), :]                   # root features, bf16
        fused_in = jnp.concatenate(
            [agg.astype(jnp.bfloat16), x_tile], axis=1)      # (TM, 2*F_pad)
        h = jnp.dot(fused_in, w1_ref[...],
                    preferred_element_type=jnp.float32) + b1_ref[...]
        h1_ref[pl.ds(row0, tm), :] = jnp.maximum(h, 0.0).astype(jnp.bfloat16)

    # ------- phase 1: conv2 + ReLU, pooled accumulation, final FCs --------
    @pl.when(phase == 1)
    def _():
        @pl.when(i == 0)
        def _():
            pool_acc_ref[...] = jnp.zeros_like(pool_acc_ref)

        a_tile = a_ref[...]                                  # (TM, N_pad) bf16
        h1_full = h1_ref[...]                                # (N_pad, H_pad) bf16
        agg2 = jnp.dot(a_tile, h1_full,
                       preferred_element_type=jnp.float32)   # (TM, H_pad) f32
        h1_tile = h1_ref[pl.ds(row0, tm), :]                 # (TM, H_pad) bf16
        fused_in = jnp.concatenate(
            [agg2.astype(jnp.bfloat16), h1_tile], axis=1)    # (TM, 2*H_pad)
        h2 = jnp.dot(fused_in, w2_ref[...],
                     preferred_element_type=jnp.float32) + b2_ref[...]
        h2 = jnp.maximum(h2, 0.0).astype(jnp.bfloat16)       # (TM, H_pad)

        # partial mean-pool: P[:, tile] @ h2_tile, accumulated in f32
        pool_acc_ref[...] += jnp.dot(p_ref[...], h2,
                                     preferred_element_type=jnp.float32)

        @pl.when(i == n_tiles - 1)
        def _():
            pooled = pool_acc_ref[...].astype(jnp.bfloat16)  # (G_pad, H_pad)
            z = jnp.dot(pooled, wf1_ref[...],
                        preferred_element_type=jnp.float32) + bf1_ref[...]
            z = jnp.maximum(z, 0.0).astype(jnp.bfloat16)
            out = jnp.dot(z, wf2_ref[...],
                          preferred_element_type=jnp.float32) + bf2_ref[...]
            out_ref[...] = out                               # (G_pad, O_pad)


# --------------------------------------------------------------------------
# Wrapper: pad to hardware tiles, fuse rel/root weights, cast MXU inputs to
# bf16, launch the tiled kernel and slice out the real (G, 1) result.
# --------------------------------------------------------------------------
def gnn_forward(x, adj, pool, params):
    N, F = x.shape
    G = pool.shape[0]
    H = params["wr1"].shape[1]

    TM = _choose_row_tile(N)
    N_pad = _round_up(N, TM)
    F_pad = _round_up(F, LANE)
    H_pad = _round_up(H, LANE)
    G_pad = _round_up(G, SUB)
    O_pad = LANE            # fc2 output padded to one lane-dense vreg width

    def pad2(a, rows, cols):
        return jnp.pad(a, ((0, rows - a.shape[0]), (0, cols - a.shape[1])))

    bf = jnp.bfloat16
    x_p = pad2(x, N_pad, F_pad).astype(bf)
    a_p = pad2(adj, N_pad, N_pad).astype(bf)
    p_p = pad2(pool, G_pad, N_pad).astype(bf)

    # Fused GraphConv weights: concat([W_rel; W_root]) along the contraction axis.
    w1 = jnp.concatenate([pad2(params["wr1"], F_pad, H_pad),
                          pad2(params["wroot1"], F_pad, H_pad)], axis=0).astype(bf)
    b1 = pad2(params["b1"], 1, H_pad).astype(jnp.float32)
    w2 = jnp.concatenate([pad2(params["wr2"], H_pad, H_pad),
                          pad2(params["wroot2"], H_pad, H_pad)], axis=0).astype(bf)
    b2 = pad2(params["b2"], 1, H_pad).astype(jnp.float32)
    wf1 = pad2(params["wf1"], H_pad, H_pad).astype(bf)
    bf1 = pad2(params["bf1"], 1, H_pad).astype(jnp.float32)
    wf2 = pad2(params["wf2"], H_pad, O_pad).astype(bf)
    bf2 = pad2(params["bf2"], 1, O_pad).astype(jnp.float32)

    n_tiles = N_pad // TM
    grid = (2, n_tiles)                 # (phase, node row tile)

    def full_spec(arr):
        return pl.BlockSpec(arr.shape, lambda p, i: (0,) * arr.ndim)

    out_pad = pl.pallas_call(
        gnn_kernel,
        out_shape=jax.ShapeDtypeStruct((G_pad, O_pad), jnp.float32),
        grid_spec=pltpu.PrefetchScalarGridSpec(
            num_scalar_prefetch=0,
            grid=grid,
            in_specs=[
                pl.BlockSpec((TM, N_pad), lambda p, i: (i, 0)),    # A row tile
                full_spec(x_p),                                    # X (resident)
                # Pool column tiles are only needed in phase 1; keep block 0
                # resident during phase 0 (index doesn't change -> no re-DMA).
                pl.BlockSpec((G_pad, TM), lambda p, i: (0, i * p)),
                full_spec(w1), full_spec(b1),
                full_spec(w2), full_spec(b2),
                full_spec(wf1), full_spec(bf1),
                full_spec(wf2), full_spec(bf2),
            ],
            out_specs=pl.BlockSpec((G_pad, O_pad), lambda p, i: (0, 0)),
            scratch_shapes=[
                pltpu.VMEM((N_pad, H_pad), jnp.bfloat16),   # resident h1
                pltpu.VMEM((G_pad, H_pad), jnp.float32),    # pooled accumulator
            ]),
        compiler_params=pltpu.CompilerParams(
            # Both axes sequential: conv2 needs every conv1 tile (resident h1
            # scratch) and the pooled sum is carried across tiles.
            dimension_semantics=("arbitrary", "arbitrary"),
            vmem_limit_bytes=32 * 1024 * 1024),
    )(a_p, x_p, p_p, w1, b1, w2, b2, wf1, bf1, wf2, bf2)

    return out_pad[:G, :1]


# ----------------- plain-JAX glue: dense operators from graph data ----------
def build_adjacency(edge_index, num_nodes):
    """A[dst, src] += 1 for each edge src->dst (sum aggregation, unweighted)."""
    src, dst = edge_index[0], edge_index[1]
    a = jnp.zeros((num_nodes, num_nodes), jnp.float32)
    return a.at[dst, src].add(1.0)


def build_mean_pool(batch, num_graphs, num_nodes):
    """P[g, n] = 1/count(g) if batch[n] == g else 0."""
    onehot = (batch[None, :] == jnp.arange(num_graphs)[:, None]).astype(jnp.float32)
    counts = jnp.maximum(onehot.sum(axis=1, keepdims=True), 1.0)
    return onehot / counts


def init_params(key, input_dim, hidden_dim):
    ks = jax.random.split(key, 10)

    def u(k, shape, fan_in):
        bound = 1.0 / jnp.sqrt(fan_in)
        return jax.random.uniform(k, shape, jnp.float32, -bound, bound)

    return {
        # conv1 (GraphConv): lin_rel has bias, lin_root has none
        "wr1":    u(ks[0], (input_dim, hidden_dim), input_dim),
        "wroot1": u(ks[1], (input_dim, hidden_dim), input_dim),
        "b1":     u(ks[2], (1, hidden_dim), input_dim),
        # conv2
        "wr2":    u(ks[3], (hidden_dim, hidden_dim), hidden_dim),
        "wroot2": u(ks[4], (hidden_dim, hidden_dim), hidden_dim),
        "b2":     u(ks[5], (1, hidden_dim), hidden_dim),
        # fc1
        "wf1":    u(ks[6], (hidden_dim, hidden_dim), hidden_dim),
        "bf1":    u(ks[7], (1, hidden_dim), hidden_dim),
        # fc2
        "wf2":    u(ks[8], (hidden_dim, 1), hidden_dim),
        "bf2":    u(ks[9], (1, 1), hidden_dim),
    }


def ref_forward(x, adj, pool, p):
    """Pure-JAX reference that mirrors the kernel's bf16-input / f32-accumulate
    math so the comparison is tight."""
    bf = lambda a: a.astype(jnp.bfloat16)
    dot = lambda a, b: jnp.dot(bf(a), bf(b), preferred_element_type=jnp.float32)
    agg1 = dot(adj, x)
    h1 = jnp.maximum(dot(agg1, p["wr1"]) + dot(x, p["wroot1"]) + p["b1"], 0.0)
    agg2 = dot(adj, h1)
    h2 = jnp.maximum(dot(agg2, p["wr2"]) + dot(h1, p["wroot2"]) + p["b2"], 0.0)
    g = dot(pool, h2)
    z = jnp.maximum(dot(g, p["wf1"]) + p["bf1"], 0.0)
    return dot(z, p["wf2"]) + p["bf2"]


if __name__ == "__main__":
    key = jax.random.PRNGKey(0)
    k_x, k_e, k_p = jax.random.split(key, 3)

    # Small but non-trivial sizes (N pads to 256).
    num_nodes = 200
    num_graphs = 2
    input_dim = 8
    hidden_dim = 32
    num_edges = 600

    # node features
    x = jax.random.normal(k_x, (num_nodes, input_dim), jnp.float32)

    # deterministic edge_index [2, E]: ring edges + random edges
    ring_src = jnp.arange(num_nodes)
    ring_dst = (ring_src + 1) % num_nodes
    rand = jax.random.randint(k_e, (2, num_edges - num_nodes), 0, num_nodes)
    edge_index = jnp.concatenate(
        [jnp.stack([ring_src, ring_dst]), rand], axis=1).astype(jnp.int32)

    # graph assignment: first half nodes -> graph 0, second half -> graph 1
    batch = jnp.concatenate([jnp.zeros(num_nodes // 2, jnp.int32),
                             jnp.ones(num_nodes - num_nodes // 2, jnp.int32)])

    adj = build_adjacency(edge_index, num_nodes)
    pool = build_mean_pool(batch, num_graphs, num_nodes)
    params = init_params(k_p, input_dim, hidden_dim)

    out = gnn_forward(x, adj, pool, params)
    jax.block_until_ready(out)
    assert out.shape == (num_graphs, 1)

    ref = ref_forward(x, adj, pool, params)
    assert jnp.allclose(out, ref, atol=1e-2, rtol=1e-2), (out, ref)

    print("KERNEL_OK")
</pallas_src>

<mosaic_0001>
module attributes {stable_mosaic.version = 11 : i64} {
  func.func @gnn_kernel(%arg0: i32, %arg1: i32, %arg2: memref<256x256xbf16, #tpu.memory_space<vmem>>, %arg3: memref<256x128xbf16, #tpu.memory_space<vmem>>, %arg4: memref<8x256xbf16, #tpu.memory_space<vmem>>, %arg5: memref<256x128xbf16, #tpu.memory_space<vmem>>, %arg6: memref<1x128xf32, #tpu.memory_space<vmem>>, %arg7: memref<256x128xbf16, #tpu.memory_space<vmem>>, %arg8: memref<1x128xf32, #tpu.memory_space<vmem>>, %arg9: memref<128x128xbf16, #tpu.memory_space<vmem>>, %arg10: memref<1x128xf32, #tpu.memory_space<vmem>>, %arg11: memref<128x128xbf16, #tpu.memory_space<vmem>>, %arg12: memref<1x128xf32, #tpu.memory_space<vmem>>, %arg13: memref<8x128xf32, #tpu.memory_space<vmem>>, %arg14: memref<256x128xbf16, #tpu.memory_space<vmem>>, %arg15: memref<8x128xf32, #tpu.memory_space<vmem>>) attributes {dimension_semantics = [#tpu.dimension_semantics<arbitrary>, #tpu.dimension_semantics<arbitrary>], iteration_bounds = array<i64: 2, 1>, scalar_prefetch = 0 : i64, scratch_operands = 2 : i64, tpu.core_type = #tpu.core_type<tc>, window_params = [{transform_indices = @transform_0, window_bounds = array<i64: 256, 256>}, {pipeline_mode = #tpu.pipeline_mode<synchronous>, transform_indices = @transform_1, window_bounds = array<i64: 256, 128>}, {transform_indices = @transform_2, window_bounds = array<i64: 8, 256>}, {pipeline_mode = #tpu.pipeline_mode<synchronous>, transform_indices = @transform_3, window_bounds = array<i64: 256, 128>}, {pipeline_mode = #tpu.pipeline_mode<synchronous>, transform_indices = @transform_4, window_bounds = array<i64: 1, 128>}, {pipeline_mode = #tpu.pipeline_mode<synchronous>, transform_indices = @transform_5, window_bounds = array<i64: 256, 128>}, {pipeline_mode = #tpu.pipeline_mode<synchronous>, transform_indices = @transform_6, window_bounds = array<i64: 1, 128>}, {pipeline_mode = #tpu.pipeline_mode<synchronous>, transform_indices = @transform_7, window_bounds = array<i64: 128, 128>}, {pipeline_mode = #tpu.pipeline_mode<synchronous>, transform_indices = @transform_8, window_bounds = array<i64: 1, 128>}, {pipeline_mode = #tpu.pipeline_mode<synchronous>, transform_indices = @transform_9, window_bounds = array<i64: 128, 128>}, {pipeline_mode = #tpu.pipeline_mode<synchronous>, transform_indices = @transform_10, window_bounds = array<i64: 1, 128>}, {pipeline_mode = #tpu.pipeline_mode<synchronous>, transform_indices = @transform_11, window_bounds = array<i64: 8, 128>}]} {
    %c256_i32 = arith.constant 256 : i32
    %0 = arith.muli %arg1, %c256_i32 : i32
    %1 = tpu.assume_multiple %0, 256 : i32
    %c0_i32 = arith.constant 0 : i32
    %2 = arith.cmpi eq, %arg0, %c0_i32 : i32
    %3 = arith.extui %2 : i1 to i32
    %c0_i32_0 = arith.constant 0 : i32
    %4 = arith.cmpi ne, %3, %c0_i32_0 : i32
    scf.if %4 {
      %c0 = arith.constant 0 : index
      %c0_2 = arith.constant 0 : index
      %8 = vector.load %arg2[%c0, %c0_2] : memref<256x256xbf16, #tpu.memory_space<vmem>>, vector<256x256xbf16>
      %c0_3 = arith.constant 0 : index
      %c0_4 = arith.constant 0 : index
      %9 = vector.load %arg3[%c0_3, %c0_4] : memref<256x128xbf16, #tpu.memory_space<vmem>>, vector<256x128xbf16>
      %cst = arith.constant dense<0.000000e+00> : vector<256x128xf32>
      %10 = tpu.matmul %8, %9, %cst {dimension_numbers = #tpu.dot_dimension_numbers<[1], [0], [0], [1], [0, 0, 1, 1], [], []>} : vector<256x256xbf16>, vector<256x128xbf16>, vector<256x128xf32> -> vector<256x128xf32>
      %11 = arith.index_cast %1 : i32 to index
      %c0_5 = arith.constant 0 : index
      %12 = vector.load %arg3[%11, %c0_5] : memref<256x128xbf16, #tpu.memory_space<vmem>>, vector<256x128xbf16>
      %13 = arith.truncf %10 : vector<256x128xf32> to vector<256x128xbf16>
      %14 = tpu.concatenate %13, %12 in 1 : vector<256x128xbf16>, vector<256x128xbf16> -> vector<256x256xbf16>
      %c0_6 = arith.constant 0 : index
      %c0_7 = arith.constant 0 : index
      %15 = vector.load %arg5[%c0_6, %c0_7] : memref<256x128xbf16, #tpu.memory_space<vmem>>, vector<256x128xbf16>
      %cst_8 = arith.constant dense<0.000000e+00> : vector<256x128xf32>
      %16 = tpu.matmul %14, %15, %cst_8 {dimension_numbers = #tpu.dot_dimension_numbers<[1], [0], [0], [1], [0, 0, 1, 1], [], []>} : vector<256x256xbf16>, vector<256x128xbf16>, vector<256x128xf32> -> vector<256x128xf32>
      %c0_9 = arith.constant 0 : index
      %c0_10 = arith.constant 0 : index
      %17 = vector.load %arg6[%c0_9, %c0_10] : memref<1x128xf32, #tpu.memory_space<vmem>>, vector<1x128xf32>
      %18 = vector.broadcast %17 : vector<1x128xf32> to vector<256x128xf32>
      %19 = arith.addf %16, %18 : vector<256x128xf32>
      %cst_11 = arith.constant 0.000000e+00 : f32
      %20 = vector.broadcast %cst_11 : f32 to vector<256x128xf32>
      %21 = arith.maximumf %19, %20 : vector<256x128xf32>
      %22 = arith.truncf %21 : vector<256x128xf32> to vector<256x128xbf16>
      %23 = arith.index_cast %1 : i32 to index
      %c0_12 = arith.constant 0 : index
      %24 = vector.load %arg14[%23, %c0_12] : memref<256x128xbf16, #tpu.memory_space<vmem>>, vector<256x128xbf16>
      tpu.vector_store %arg14[%23, %c0_12], %22 {strides = array<i32>} : memref<256x128xbf16, #tpu.memory_space<vmem>>, vector<256x128xbf16>,
    } else {
    }
    %c1_i32 = arith.constant 1 : i32
    %5 = arith.cmpi eq, %arg0, %c1_i32 : i32
    %6 = arith.extui %5 : i1 to i32
    %c0_i32_1 = arith.constant 0 : i32
    %7 = arith.cmpi ne, %6, %c0_i32_1 : i32
    scf.if %7 {
      %c0_i32_2 = arith.constant 0 : i32
      %8 = arith.cmpi eq, %arg1, %c0_i32_2 : i32
      %9 = arith.extui %8 : i1 to i32
      %c0_i32_3 = arith.constant 0 : i32
      %10 = arith.cmpi ne, %9, %c0_i32_3 : i32
      scf.if %10 {
        %cst_23 = arith.constant 0.000000e+00 : f32
        %34 = vector.broadcast %cst_23 : f32 to vector<8x128xf32>
        %c0_24 = arith.constant 0 : index
        %c0_25 = arith.constant 0 : index
        %35 = vector.load %arg15[%c0_24, %c0_25] : memref<8x128xf32, #tpu.memory_space<vmem>>, vector<8x128xf32>
        tpu.vector_store %arg15[%c0_24, %c0_25], %34 {strides = array<i32>} : memref<8x128xf32, #tpu.memory_space<vmem>>, vector<8x128xf32>,
      } else {
      }
      %c0 = arith.constant 0 : index
      %c0_4 = arith.constant 0 : index
      %11 = vector.load %arg2[%c0, %c0_4] : memref<256x256xbf16, #tpu.memory_space<vmem>>, vector<256x256xbf16>
      %c0_5 = arith.constant 0 : index
      %c0_6 = arith.constant 0 : index
      %12 = vector.load %arg14[%c0_5, %c0_6] : memref<256x128xbf16, #tpu.memory_space<vmem>>, vector<256x128xbf16>
      %cst = arith.constant dense<0.000000e+00> : vector<256x128xf32>
      %13 = tpu.matmul %11, %12, %cst {dimension_numbers = #tpu.dot_dimension_numbers<[1], [0], [0], [1], [0, 0, 1, 1], [], []>} : vector<256x256xbf16>, vector<256x128xbf16>, vector<256x128xf32> -> vector<256x128xf32>
      %14 = arith.index_cast %1 : i32 to index
      %c0_7 = arith.constant 0 : index
      %15 = vector.load %arg14[%14, %c0_7] : memref<256x128xbf16, #tpu.memory_space<vmem>>, vector<256x128xbf16>
      %16 = arith.truncf %13 : vector<256x128xf32> to vector<256x128xbf16>
      %17 = tpu.concatenate %16, %15 in 1 : vector<256x128xbf16>, vector<256x128xbf16> -> vector<256x256xbf16>
      %c0_8 = arith.constant 0 : index
      %c0_9 = arith.constant 0 : index
      %18 = vector.load %arg7[%c0_8, %c0_9] : memref<256x128xbf16, #tpu.memory_space<vmem>>, vector<256x128xbf16>
      %cst_10 = arith.constant dense<0.000000e+00> : vector<256x128xf32>
      %19 = tpu.matmul %17, %18, %cst_10 {dimension_numbers = #tpu.dot_dimension_numbers<[1], [0], [0], [1], [0, 0, 1, 1], [], []>} : vector<256x256xbf16>, vector<256x128xbf16>, vector<256x128xf32> -> vector<256x128xf32>
      %c0_11 = arith.constant 0 : index
      %c0_12 = arith.constant 0 : index
      %20 = vector.load %arg8[%c0_11, %c0_12] : memref<1x128xf32, #tpu.memory_space<vmem>>, vector<1x128xf32>
      %21 = vector.broadcast %20 : vector<1x128xf32> to vector<256x128xf32>
      %22 = arith.addf %19, %21 : vector<256x128xf32>
      %cst_13 = arith.constant 0.000000e+00 : f32
      %23 = vector.broadcast %cst_13 : f32 to vector<256x128xf32>
      %24 = arith.maximumf %22, %23 : vector<256x128xf32>
      %25 = arith.truncf %24 : vector<256x128xf32> to vector<256x128xbf16>
      %c0_14 = arith.constant 0 : index
      %c0_15 = arith.constant 0 : index
      %26 = vector.load %arg15[%c0_14, %c0_15] : memref<8x128xf32, #tpu.memory_space<vmem>>, vector<8x128xf32>
      %c0_16 = arith.constant 0 : index
      %c0_17 = arith.constant 0 : index
      %27 = vector.load %arg4[%c0_16, %c0_17] : memref<8x256xbf16, #tpu.memory_space<vmem>>, vector<8x256xbf16>
      %cst_18 = arith.constant dense<0.000000e+00> : vector<8x128xf32>
      %28 = tpu.matmul %27, %25, %cst_18 {dimension_numbers = #tpu.dot_dimension_numbers<[1], [0], [0], [1], [0, 0, 1, 1], [], []>} : vector<8x256xbf16>, vector<256x128xbf16>, vector<8x128xf32> -> vector<8x128xf32>
      %29 = arith.addf %26, %28 : vector<8x128xf32>
      %c0_19 = arith.constant 0 : index
      %c0_20 = arith.constant 0 : index
      %30 = vector.load %arg15[%c0_19, %c0_20] : memref<8x128xf32, #tpu.memory_space<vmem>>, vector<8x128xf32>
      tpu.vector_store %arg15[%c0_19, %c0_20], %29 {strides = array<i32>} : memref<8x128xf32, #tpu.memory_space<vmem>>, vector<8x128xf32>,
      %c0_i32_21 = arith.constant 0 : i32
      %31 = arith.cmpi eq, %arg1, %c0_i32_21 : i32
      %32 = arith.extui %31 : i1 to i32
      %c0_i32_22 = arith.constant 0 : i32
      %33 = arith.cmpi ne, %32, %c0_i32_22 : i32
      scf.if %33 {
        %c0_23 = arith.constant 0 : index
        %c0_24 = arith.constant 0 : index
        %34 = vector.load %arg15[%c0_23, %c0_24] : memref<8x128xf32, #tpu.memory_space<vmem>>, vector<8x128xf32>
        %35 = arith.truncf %34 : vector<8x128xf32> to vector<8x128xbf16>
        %c0_25 = arith.constant 0 : index
        %c0_26 = arith.constant 0 : index
        %36 = vector.load %arg9[%c0_25, %c0_26] : memref<128x128xbf16, #tpu.memory_space<vmem>>, vector<128x128xbf16>
        %cst_27 = arith.constant dense<0.000000e+00> : vector<8x128xf32>
        %37 = tpu.matmul %35, %36, %cst_27 {dimension_numbers = #tpu.dot_dimension_numbers<[1], [0], [0], [1], [0, 0, 1, 1], [], []>} : vector<8x128xbf16>, vector<128x128xbf16>, vector<8x128xf32> -> vector<8x128xf32>
        %c0_28 = arith.constant 0 : index
        %c0_29 = arith.constant 0 : index
        %38 = vector.load %arg10[%c0_28, %c0_29] : memref<1x128xf32, #tpu.memory_space<vmem>>, vector<1x128xf32>
        %39 = vector.broadcast %38 : vector<1x128xf32> to vector<8x128xf32>
        %40 = arith.addf %37, %39 : vector<8x128xf32>
        %cst_30 = arith.constant 0.000000e+00 : f32
        %41 = vector.broadcast %cst_30 : f32 to vector<8x128xf32>
        %42 = arith.maximumf %40, %41 : vector<8x128xf32>
        %43 = arith.truncf %42 : vector<8x128xf32> to vector<8x128xbf16>
        %c0_31 = arith.constant 0 : index
        %c0_32 = arith.constant 0 : index
        %44 = vector.load %arg11[%c0_31, %c0_32] : memref<128x128xbf16, #tpu.memory_space<vmem>>, vector<128x128xbf16>
        %cst_33 = arith.constant dense<0.000000e+00> : vector<8x128xf32>
        %45 = tpu.matmul %43, %44, %cst_33 {dimension_numbers = #tpu.dot_dimension_numbers<[1], [0], [0], [1], [0, 0, 1, 1], [], []>} : vector<8x128xbf16>, vector<128x128xbf16>, vector<8x128xf32> -> vector<8x128xf32>
        %c0_34 = arith.constant 0 : index
        %c0_35 = arith.constant 0 : index
        %46 = vector.load %arg12[%c0_34, %c0_35] : memref<1x128xf32, #tpu.memory_space<vmem>>, vector<1x128xf32>
        %47 = vector.broadcast %46 : vector<1x128xf32> to vector<8x128xf32>
        %48 = arith.addf %45, %47 : vector<8x128xf32>
        %c0_36 = arith.constant 0 : index
        %c0_37 = arith.constant 0 : index
        %49 = vector.load %arg13[%c0_36, %c0_37] : memref<8x128xf32, #tpu.memory_space<vmem>>, vector<8x128xf32>
        tpu.vector_store %arg13[%c0_36, %c0_37], %48 {strides = array<i32>} : memref<8x128xf32, #tpu.memory_space<vmem>>, vector<8x128xf32>,
      } else {
      }
    } else {
    }
    return
  }
  func.func @transform_0(%arg0: i32, %arg1: i32) -> (i32, i32) {
    %c0_i32 = arith.constant 0 : i32
    %c0_i32_0 = arith.constant 0 : i32
    return %arg1, %c0_i32 : i32, i32
  }
  func.func @transform_1(%arg0: i32, %arg1: i32) -> (i32, i32) {
    %c0_i32 = arith.constant 0 : i32
    %c0_i32_0 = arith.constant 0 : i32
    %c0_i32_1 = arith.constant 0 : i32
    return %c0_i32, %c0_i32_0 : i32, i32
  }
  func.func @transform_2(%arg0: i32, %arg1: i32) -> (i32, i32) {
    %0 = arith.muli %arg1, %arg0 : i32
    %c0_i32 = arith.constant 0 : i32
    %c0_i32_0 = arith.constant 0 : i32
    return %c0_i32, %0 : i32, i32
  }
  func.func @transform_3(%arg0: i32, %arg1: i32) -> (i32, i32) {
    %c0_i32 = arith.constant 0 : i32
    %c0_i32_0 = arith.constant 0 : i32
    %c0_i32_1 = arith.constant 0 : i32
    return %c0_i32, %c0_i32_0 : i32, i32
  }
  func.func @transform_4(%arg0: i32, %arg1: i32) -> (i32, i32) {
    %c0_i32 = arith.constant 0 : i32
    %c0_i32_0 = arith.constant 0 : i32
    %c0_i32_1 = arith.constant 0 : i32
    return %c0_i32, %c0_i32_0 : i32, i32
  }
  func.func @transform_5(%arg0: i32, %arg1: i32) -> (i32, i32) {
    %c0_i32 = arith.constant 0 : i32
    %c0_i32_0 = arith.constant 0 : i32
    %c0_i32_1 = arith.constant 0 : i32
    return %c0_i32, %c0_i32_0 : i32, i32
  }
  func.func @transform_6(%arg0: i32, %arg1: i32) -> (i32, i32) {
    %c0_i32 = arith.constant 0 : i32
    %c0_i32_0 = arith.constant 0 : i32
    %c0_i32_1 = arith.constant 0 : i32
    return %c0_i32, %c0_i32_0 : i32, i32
  }
  func.func @transform_7(%arg0: i32, %arg1: i32) -> (i32, i32) {
    %c0_i32 = arith.constant 0 : i32
    %c0_i32_0 = arith.constant 0 : i32
    %c0_i32_1 = arith.constant 0 : i32
    return %c0_i32, %c0_i32_0 : i32, i32
  }
  func.func @transform_8(%arg0: i32, %arg1: i32) -> (i32, i32) {
    %c0_i32 = arith.constant 0 : i32
    %c0_i32_0 = arith.constant 0 : i32
    %c0_i32_1 = arith.constant 0 : i32
    return %c0_i32, %c0_i32_0 : i32, i32
  }
  func.func @transform_9(%arg0: i32, %arg1: i32) -> (i32, i32) {
    %c0_i32 = arith.constant 0 : i32
    %c0_i32_0 = arith.constant 0 : i32
    %c0_i32_1 = arith.constant 0 : i32
    return %c0_i32, %c0_i32_0 : i32, i32
  }
  func.func @transform_10(%arg0: i32, %arg1: i32) -> (i32, i32) {
    %c0_i32 = arith.constant 0 : i32
    %c0_i32_0 = arith.constant 0 : i32
    %c0_i32_1 = arith.constant 0 : i32
    return %c0_i32, %c0_i32_0 : i32, i32
  }
  func.func @transform_11(%arg0: i32, %arg1: i32) -> (i32, i32) {
    %c0_i32 = arith.constant 0 : i32
    %c0_i32_0 = arith.constant 0 : i32
    %c0_i32_1 = arith.constant 0 : i32
    return %c0_i32, %c0_i32_0 : i32, i32
  }
}

</mosaic_0001>

<bundles_post_ra>
// kernel: tpu_custom_call.1
= control target key start
LH: loop header
LB: loop body
LE: loop exit
PB: predicated region body
PF: predicated region fallthrough
CT: control target
= control target key end

     0   :  { %s4449_s0 = inlined_call_operand.hbm [shape: bf16[256,256], index: 0, kind: input, shape index: {}]   ;;  %s4450_s1 = inlined_call_operand.hbm [shape: bf16[256,128], index: 1, kind: input, shape index: {}]   ;;  %s4451_s2 = inlined_call_operand.hbm [shape: bf16[8,256], index: 2, kind: input, shape index: {}]   ;;  %s4452_s3 = inlined_call_operand.hbm [shape: bf16[256,128], index: 3, kind: input, shape index: {}]   ;;  %s4453_s4 = inlined_call_operand.vmem [shape: f32[1,128], index: 4, kind: input, shape index: {}]   ;;  %s4454_s5 = inlined_call_operand.hbm [shape: bf16[256,128], index: 5, kind: input, shape index: {}]   ;;  %s4455_s6 = inlined_call_operand.vmem [shape: f32[1,128], index: 6, kind: input, shape index: {}]   ;;  %s4456_s7 = inlined_call_operand.hbm [shape: bf16[128,128], index: 7, kind: input, shape index: {}]   ;;  %s4457_s8 = inlined_call_operand.vmem [shape: f32[1,128], index: 8, kind: input, shape index: {}]   ;;  %s4458_s9 = inlined_call_operand.hbm [shape: bf16[128,128], index: 9, kind: input, shape index: {}]   ;;  %s4459_s10 = inlined_call_operand.vmem [shape: f32[1,128], index: 10, kind: input, shape index: {}]   ;;  %s4460_s11 = inlined_call_operand.hbm [shape: f32[8,128], index: 11, kind: output, shape index: {}]  }
   0x1   :  { %4465 = sst [smem:[#allocation26_spill]] %s4449_s0 }
   0x2   :  { %4466 = sst [smem:[#allocation27_spill]] %s4459_s10 }
   0x3   :  { %4467 = sst [smem:[#allocation28_spill]] %s4460_s11 }
   0x4   :  { %16 = vsyncpa [#allocation5], 0 }
   0x5   :  { %17 = vsyncpa [#allocation8], 0 }
   0x6   :  { %18 = vsyncpa [#allocation12], 0 }
   0x7   :  { %19 = vsyncpa [#allocation15], 0 }
   0x8   :  { %20 = vsyncpa [#allocation6], 0  ;;  %s4010_s17 = smov 0   ;;  %s4012_s18 = smov 0  }
   0x9   :  { %s4014_s19 = smov 0  }
   0xa LB: > { %4468 = sst [smem:[#allocation24_spill]] %s3930_s18  ;;  %s4026_s20 = sadd.s32 4294967295, %s3934_s19   ;;  %s3934_s19 = sphi %s4014_s19, %s26_s19   ;;  %s3930_s18 = sphi %s4012_s18, %s4492_s18   ;;  %s3926_s17 = sphi %s4010_s17, %s4491_s17  }
   0xb   : > { %s38_s21 = sadd.s32 1, %s3930_s18  ;;  %p2673_p1 = scmp.ge.s32.totalorder %s3934_s19, 1 }
   0xc   : > { %p40_p0 = scmp.ge.s32.totalorder %s38_s21, 2  ;;  %p307_p2 = scmp.lt.s32.totalorder %s3934_s19, 3 }
   0xd   : > { %p4461_p4 = scmp.eq.s32.totalorder %s4026_s20, 0  ;;  %s3936_s23 = smov [#allocation4]  }
   0xe   : > { %s4494_s21 = smov (%p40_p0, %s38_s21), 0  ;;  %p4033_p3 = pnand %p2673_p1, %p307_p2 }
   0xf   : > { %4469 = sst [smem:[#allocation25_spill]] %s4494_s21  ;;  %s323_s24 = sshll.u32 %s3936_s23, 4  ;;  %s324_s24 = int_to_ptr.vmem [resolvable:$true] %s323_s24 }
  0x10   : > { %s4470_s22 = scalar_select %p4033_p3, 1, 0 }
  0x11   : > { %p3406_p5 = pneg %p4033_p3  ;;  %s3937_s26 = smov [#allocation7]  }
  0x12   : > { %s336_s27 = sshll.u32 %s3937_s26, 4  ;;  %s4472_s0 = sld [smem:[#allocation26_spill]]  ;;  %s337_s27 = int_to_ptr.vmem [resolvable:$true] %s336_s27 }
  0x13   : > { %p4042_p6 = pnand %p4461_p4, %p3406_p5 }
  0x15   : > { %p4054_p8 = pneg %p4042_p6 }
  0x18   : > { %s3662_s30 = scalar_lea.hbm %s4472_s0, 4096 }
  0x19   : > { %p3663_p7 = scmp.ne.s32.totalorder %s4472_s0, %s3662_s30  ;;  %p3669_p11 = scmp.lt.u32.totalorder %s3662_s30, %s4472_s0 }
  0x1b   : > { %p3665_p9 = pnand %p4054_p8, %p3663_p7 }
  0x1d   : > { %p3666_p10 = pneg %p3665_p9 }
  0x1f   : > { %p3671_p12 = pnand %p3669_p11, %p3666_p10 }
  0x21   : > { %3674 = shalt.err (!%p3671_p12)
}
  0x22   : > { %s3675_s23 = scalar_lea.vmem %s324_s24, 4096  ;;  %p3683_p2 = scmp.lt.s32.totalorder %s324_s24, %s324_s24 }
  0x23   : > { %p3676_p13 = scmp.ne.s32.totalorder %s324_s24, %s3675_s23  ;;  %p3684_p5 = scmp.lt.s32.totalorder %s3675_s23, %s3675_s23 }
  0x25   : > { %p3678_p0 = pnand %p3676_p13, %p4054_p8  ;;  %p3685_p4 = por %p3684_p5, %p3683_p2 }
  0x27   : > { %p3679_p1 = pneg %p3678_p0 }
  0x29   : > { %p3686_p3 = pnand %p3685_p4, %p3679_p1 }
  0x2b   : > { %3689 = shalt.err (!%p3686_p3)
}
  0x2c   : > { %s3938_s26 = smov 128   ;;  %s3939_s28 = smov 8  }
  0x2d   : > { %3409 = dma.hbm_to_vmem [thread:$0]  (!%p4042_p6), %s4472_s0, 4096, %s324_s24, [#allocation5], %s3938_s26, %s3938_s26, %s3939_s28  }
  0x2e   : > { %s3690_s15 = scalar_lea.hbm %s4450_s1, 2048 }
  0x2f   : > { %p3691_p7 = scmp.ne.s32.totalorder %s4450_s1, %s3690_s15  ;;  %p3697_p9 = scmp.lt.u32.totalorder %s3690_s15, %s4450_s1 }
  0x31   : > { %p3693_p3 = pnand %p3691_p7, %p4054_p8 }
  0x33   : > { %p3694_p4 = pneg %p3693_p3 }
  0x35   : > { %p3699_p10 = pnand %p3697_p9, %p3694_p4 }
  0x37   : > { %3702 = shalt.err (!%p3699_p10)
}
  0x38   : > { %s3703_s29 = scalar_lea.vmem %s337_s27, 2048  ;;  %p3711_p0 = scmp.lt.s32.totalorder %s337_s27, %s337_s27 }
  0x39   : > { %p3704_p11 = scmp.ne.s32.totalorder %s337_s27, %s3703_s29  ;;  %p3712_p1 = scmp.lt.s32.totalorder %s3703_s29, %s3703_s29 }
  0x3b   : > { %p3706_p12 = pnand %p3704_p11, %p4054_p8  ;;  %p3713_p2 = por %p3712_p1, %p3711_p0 }
  0x3d   : > { %p3707_p13 = pneg %p3706_p12 }
  0x3f   : > { %p3714_p5 = pnand %p3713_p2, %p3707_p13 }
  0x41   : > { %3717 = shalt.err (!%p3714_p5)
}
  0x42   : > { %s3940_s21 = smov 64   ;;  %s3941_s24 = smov 4  }
  0x43   : > { %3412 = dma.hbm_to_vmem [thread:$0]  (!%p4042_p6), %s4450_s1, 2048, %s337_s27, [#allocation8], %s3940_s21, %s3940_s21, %s3941_s24  }
  0x44   : > { %s3942_s28 = smov [#allocation11]   ;;  %s3943_s12 = smov [#allocation10]  }
  0x45   : > { %s365_s30 = sshll.u32 %s3942_s28, 4  ;;  %s349_s13 = sshll.u32 %s3943_s12, 4  ;;  %s366_s30 = int_to_ptr.vmem [resolvable:$true] %s365_s30  ;;  %s350_s13 = int_to_ptr.vmem [resolvable:$true] %s349_s13 }
  0x46   : > { %s3718_s23 = scalar_lea.hbm %s4454_s5, 2048 }
  0x47   : > { %p3719_p7 = scmp.ne.s32.totalorder %s4454_s5, %s3718_s23  ;;  %p3725_p9 = scmp.lt.u32.totalorder %s3718_s23, %s4454_s5 }
  0x49   : > { %p3721_p3 = pnand %p3719_p7, %p4054_p8 }
  0x4b   : > { %p3722_p4 = pneg %p3721_p3 }
  0x4d   : > { %p3727_p10 = pnand %p3725_p9, %p3722_p4 }
  0x4f   : > { %3730 = shalt.err (!%p3727_p10)
}
  0x50   : > { %s3731_s27 = scalar_lea.vmem %s366_s30, 2048  ;;  %p3739_p0 = scmp.lt.s32.totalorder %s366_s30, %s366_s30 }
  0x51   : > { %p3732_p11 = scmp.ne.s32.totalorder %s366_s30, %s3731_s27  ;;  %p3740_p1 = scmp.lt.s32.totalorder %s3731_s27, %s3731_s27 }
  0x53   : > { %p3734_p12 = pnand %p3732_p11, %p4054_p8  ;;  %p3741_p2 = por %p3740_p1, %p3739_p0 }
  0x55   : > { %p3735_p13 = pneg %p3734_p12 }
  0x57   : > { %p3742_p5 = pnand %p3741_p2, %p3735_p13 }
  0x59   : > { %3745 = shalt.err (!%p3742_p5)
}
  0x5a   : > { %3418 = dma.hbm_to_vmem [thread:$0]  (!%p4042_p6), %s4454_s5, 2048, %s366_s30, [#allocation12], %s3940_s21, %s3940_s21, %s3941_s24  }
  0x5b   : > { %s3746_s26 = scalar_lea.hbm %s4452_s3, 2048 }
  0x5c   : > { %p3747_p7 = scmp.ne.s32.totalorder %s4452_s3, %s3746_s26  ;;  %p3753_p9 = scmp.lt.u32.totalorder %s3746_s26, %s4452_s3 }
  0x5e   : > { %p3749_p3 = pnand %p3747_p7, %p4054_p8 }
  0x60   : > { %p3750_p4 = pneg %p3749_p3 }
  0x62   : > { %p3755_p10 = pnand %p3753_p9, %p3750_p4 }
  0x64   : > { %3758 = shalt.err (!%p3755_p10)
}
  0x65   : > { %s3759_s23 = scalar_lea.vmem %s350_s13, 2048  ;;  %p3767_p0 = scmp.lt.s32.totalorder %s350_s13, %s350_s13 }
  0x66   : > { %p3760_p11 = scmp.ne.s32.totalorder %s350_s13, %s3759_s23  ;;  %p3768_p1 = scmp.lt.s32.totalorder %s3759_s23, %s3759_s23 }
  0x68   : > { %p3762_p12 = pnand %p3760_p11, %p4054_p8  ;;  %p3769_p2 = por %p3768_p1, %p3767_p0 }
  0x6a   : > { %p3763_p13 = pneg %p3762_p12 }
  0x6c   : > { %p3770_p5 = pnand %p3769_p2, %p3763_p13 }
  0x6e   : > { %3773 = shalt.err (!%p3770_p5)
}
  0x6f   : > { %3415 = dma.hbm_to_vmem [thread:$0]  (!%p4042_p6), %s4452_s3, 2048, %s350_s13, [#allocation8], %s3940_s21, %s3940_s21, %s3941_s24  }
  0x70   : > { %s3944_s27 = smov [#allocation13]   ;;  %s3945_s10 = smov [#allocation14]  }
  0x71   : > { %s381_s0 = sshll.u32 %s3944_s27, 4  ;;  %s397_s11 = sshll.u32 %s3945_s10, 4  ;;  %s382_s0 = int_to_ptr.vmem [resolvable:$true] %s381_s0  ;;  %s398_s11 = int_to_ptr.vmem [resolvable:$true] %s397_s11 }
  0x72   : > { %s3774_s28 = scalar_lea.hbm %s4456_s7, 1024 }
  0x73   : > { %p3775_p7 = scmp.ne.s32.totalorder %s4456_s7, %s3774_s28  ;;  %p3781_p9 = scmp.lt.u32.totalorder %s3774_s28, %s4456_s7 }
  0x75   : > { %p3777_p3 = pnand %p3775_p7, %p4054_p8 }
  0x77   : > { %p3778_p4 = pneg %p3777_p3 }
  0x79   : > { %p3783_p10 = pnand %p3781_p9, %p3778_p4 }
  0x7b   : > { %3786 = shalt.err (!%p3783_p10)
}
  0x7c   : > { %s3787_s13 = scalar_lea.vmem %s382_s0, 1024  ;;  %p3795_p0 = scmp.lt.s32.totalorder %s382_s0, %s382_s0 }
  0x7d   : > { %p3788_p11 = scmp.ne.s32.totalorder %s382_s0, %s3787_s13  ;;  %p3796_p1 = scmp.lt.s32.totalorder %s3787_s13, %s3787_s13 }
  0x7f   : > { %p3790_p12 = pnand %p3788_p11, %p4054_p8  ;;  %p3797_p2 = por %p3796_p1, %p3795_p0 }
  0x81   : > { %p3791_p13 = pneg %p3790_p12 }
  0x83   : > { %p3798_p5 = pnand %p3797_p2, %p3791_p13 }
  0x85   : > { %3801 = shalt.err (!%p3798_p5)
}
  0x86   : > { %3421 = dma.hbm_to_vmem [thread:$0]  (!%p4042_p6), %s4456_s7, 1024, %s382_s0, [#allocation12], %s3940_s21, %s3940_s21, %s3941_s24  }
  0x87   : > { %s3802_s18 = scalar_lea.hbm %s4458_s9, 1024 }
  0x88   : > { %p3803_p3 = scmp.ne.s32.totalorder %s4458_s9, %s3802_s18  ;;  %p3809_p10 = scmp.lt.u32.totalorder %s3802_s18, %s4458_s9 }
  0x8a   : > { %p3805_p4 = pnand %p3803_p3, %p4054_p8 }
  0x8c   : > { %p3806_p9 = pneg %p3805_p4 }
  0x8e   : > { %p3811_p11 = pnand %p3809_p10, %p3806_p9 }
  0x90   : > { %3814 = shalt.err (!%p3811_p11)
}
  0x91   : > { %s3815_s0 = scalar_lea.vmem %s398_s11, 1024  ;;  %p3823_p1 = scmp.lt.s32.totalorder %s398_s11, %s398_s11 }
  0x92   : > { %p3816_p12 = scmp.ne.s32.totalorder %s398_s11, %s3815_s0  ;;  %p3824_p2 = scmp.lt.s32.totalorder %s3815_s0, %s3815_s0 }
  0x94   : > { %p3818_p13 = pnand %p3816_p12, %p4054_p8  ;;  %p3825_p5 = por %p3824_p2, %p3823_p1 }
  0x96   : > { %p3819_p0 = pneg %p3818_p13 }
  0x98   : > { %p3826_p7 = pnand %p3825_p5, %p3819_p0 }
  0x9a   : > { %3829 = shalt.err (!%p3826_p7)
}
  0x9b   : > { %3424 = dma.hbm_to_vmem [thread:$0]  (!%p4042_p6), %s4458_s9, 1024, %s398_s11, [#allocation15], %s3940_s21, %s3940_s21, %s3941_s24  }
  0x9c   : > { %p3436_p3 = scmp.eq.s32.totalorder %s3934_s19, 0  ;;  %s414_s14 = sand.u32 1, %s3934_s19  }
  0x9d   : > { %s3946_s13 = smov [#allocation9]   ;;  %p4474_p8 = scmp.lt.s32.totalorder %s3934_s19, 2 }
  0x9e   : > { %s427_s30 = sshll.u32 %s3946_s13, 4  ;;  %s415_s25 = scalar_lea.sflag [#allocation5], %s414_s14  ;;  %s428_s30 = int_to_ptr.vmem [resolvable:$true] %s427_s30 }
  0x9f   : > { %p4180_p4 = pnand %p3436_p3, %p4474_p8  ;;  %s3830_s18 = scalar_lea.hbm %s4451_s2, 128 }
  0xa0   : > { %p3831_p6 = scmp.ne.s32.totalorder %s4451_s2, %s3830_s18  ;;  %p3837_p11 = scmp.lt.u32.totalorder %s3830_s18, %s4451_s2 }
  0xa1   : > { %p3832_p7 = pneg %p4180_p4 }
  0xa3   : > { %p3833_p9 = pnand %p3832_p7, %p3831_p6 }
  0xa5   : > { %p3834_p10 = pneg %p3833_p9 }
  0xa7   : > { %p3839_p12 = pnand %p3837_p11, %p3834_p10 }
  0xa9   : > { %3842 = shalt.err (!%p3839_p12)
}
  0xaa   : > { %s3843_s11 = scalar_lea.vmem %s428_s30, 128  ;;  %s3850_s12 = scalar_lea.vmem %s428_s30, 256 }
  0xab   : > { %p3844_p13 = scmp.ne.s32.totalorder %s428_s30, %s3843_s11  ;;  %p3851_p2 = scmp.lt.s32.totalorder %s428_s30, %s428_s30 }
  0xac   : > { %p3852_p5 = scmp.lt.s32.totalorder %s3850_s12, %s3843_s11 }
  0xad   : > { %p3846_p0 = pnand %p3844_p13, %p3832_p7 }
  0xae   : > { %p3853_p3 = por %p3852_p5, %p3851_p2 }
  0xaf   : > { %p3847_p1 = pneg %p3846_p0 }
  0xb1   : > { %p3854_p8 = pnand %p3853_p3, %p3847_p1 }
  0xb3   : > { %3857 = shalt.err (!%p3854_p8)
}
  0xb4   : > { %3428 = dma.hbm_to_vmem [thread:$0]  (!%p4180_p4), %s4451_s2, 128, %s428_s30, %s415_s25  }
  0xb5   : > { %p4476_p6 = scmp.ne.s32.totalorder %s4470_s22, 0 }
  0xb6   : > { %p4477_p9 = scmp.eq.s32.totalorder (!%p4476_p6), %s4026_s20, 0 }
  0xb7   : > { %436 = sbr.rel (%p4476_p6) target bundleno = 2086 (0x826), region = 64 }
  0xbe   : > { %3897 = dma.done.wait (%p4477_p9), [#allocation5], 4096   ;;  %p4478_p7 = pmov %p4477_p9 }
  0xc0   : > { %3899 = vsyncadd (%p4478_p7), [#allocation5], 4294963200  ;;  %p4479_p10 = pmov %p4478_p7 }
  0xc1   : > { %p4480_p11 = pmov %p4478_p7 }
  0xc2   : > { %3901 = dma.done.wait (%p4479_p10), [#allocation8], 2048  }
  0xc3   : > { %3903 = vsyncadd (%p4480_p11), [#allocation8], 4294965248  ;;  %s446_s16 = sand.u32 1, %s4026_s20   ;;  %p4481_p4 = pmov %p4478_p7 }
  0xc4   : > { %s447_s23 = scalar_lea.sflag [#allocation5], %s446_s16 }
  0xc5   : > { %3905 = dma.done.wait (%p4481_p4), %s447_s23, 128   ;;  %p4482_p12 = pmov %p4481_p4 }
  0xc6   : > { %p4483_p13 = pmov %p4481_p4 }
  0xc7   : > { %3907 = vsyncadd (%p4482_p12), %s447_s23, 4294967168 }
  0xc8   : > { %3909 = dma.done.wait (%p4483_p13), [#allocation8], 2048   ;;  %p4484_p0 = pmov %p4481_p4 }
  0xca   : > { %3911 = vsyncadd (%p4484_p0), [#allocation8], 4294965248  ;;  %p4485_p1 = pmov %p4484_p0 }
  0xcb   : > { %p4486_p2 = pmov %p4484_p0 }
  0xcc   : > { %3913 = dma.done.wait (%p4485_p1), [#allocation12], 3072  }
  0xcd   : > { %3915 = vsyncadd (%p4486_p2), [#allocation12], 4294964224  ;;  %p4487_p5 = pmov %p4484_p0 }
  0xce   : > { %p4488_p3 = pmov %p4484_p0 }
  0xcf   : > { %3917 = dma.done.wait (%p4487_p5), [#allocation15], 1024  }
  0xd0   : > { %3919 = vsyncadd (%p4488_p3), [#allocation15], 4294966272  ;;  %p2690_p8 = scmp.ne.s32.totalorder %s3926_s17, 0 }
  0xd1   : > { %v3484_v0 = vld [vmem:[#allocation7 + $0x40] sm:$0xff] (!%p2690_p8)   ;;  %v3486_v2 = vld [vmem:[#allocation7 + $0x48] sm:$0xff] (!%p2690_p8)   ;;  %v3488_v4 = vld [vmem:[#allocation7 + $0x50] sm:$0xff] (!%p2690_p8)  }
  0xd2   : > { %508 = sbr.rel (%p2690_p8) target bundleno = 805 (0x325), region = 96  ;;  %v3485_v1 = vld [vmem:[#allocation7] sm:$0xff] (!%p2690_p8)   ;;  %2846 = vmatprep.subr.bf16.mxu0 (!%p2690_p8), %v3484_v0  ;;  %v3487_v3 = vld [vmem:[#allocation7 + $0x8] sm:$0xff] (!%p2690_p8)   ;;  %v3489_v5 = vld [vmem:[#allocation7 + $0x10] sm:$0xff] (!%p2690_p8)  }
  0xd3   : > { %2847 = vmatpush3.bf16.msra.mxu0 (!%p2690_p8), %v3485_v1  ;;  %v3490_v6 = vld [vmem:[#allocation7 + $0x58] sm:$0xff] (!%p2690_p8)   ;;  %v3492_v8 = vld [vmem:[#allocation7 + $0x60] sm:$0xff] (!%p2690_p8)   ;;  %v3494_v10 = vld [vmem:[#allocation7 + $0x68] sm:$0xff] (!%p2690_p8)  }
  0xd4   : > { %2848 = vmatprep.subr.bf16.mxu0 (!%p2690_p8), %v3486_v2  ;;  %v3491_v7 = vld [vmem:[#allocation7 + $0x18] sm:$0xff] (!%p2690_p8)   ;;  %v3493_v9 = vld [vmem:[#allocation7 + $0x20] sm:$0xff] (!%p2690_p8)   ;;  %v3495_v12 = vld [vmem:[#allocation7 + $0x28] sm:$0xff] (!%p2690_p8)  }
  0xd5   : > { %v3502_v11 = vld [vmem:[#allocation4 + $0x4] ss:$8 sps:$4 sm:$0xff] (!%p2690_p8)   ;;  %v3496_v13 = vld [vmem:[#allocation7 + $0x70] sm:$0xff] (!%p2690_p8)   ;;  %v3498_v15 = vld [vmem:[#allocation7 + $0x78] sm:$0xff] (!%p2690_p8)  }
  0xd6   : > { %861 = vmatprep.mubr.bf16.mxu0 (!%p2690_p8), %v3502_v11  ;;  %v3497_v14 = vld [vmem:[#allocation7 + $0x30] sm:$0xff] (!%p2690_p8)   ;;  %v3499_v16 = vld [vmem:[#allocation7 + $0x38] sm:$0xff] (!%p2690_p8)   ;;  %v3500_v17 = vld [vmem:[#allocation4] ss:$8 sps:$4 sm:$0xff] (!%p2690_p8)  }
  0xd7   : > { %2849 = vmatpush3.bf16.msra.mxu0 (!%p2690_p8), %v3487_v3  ;;  %v3503_v18 = vld [vmem:[#allocation4 + $0x14] ss:$8 sps:$4 sm:$0xff] (!%p2690_p8)   ;;  %v3505_v19 = vld [vmem:[#allocation4 + $0x10] ss:$8 sps:$4 sm:$0xff] (!%p2690_p8)   ;;  %v3506_v20 = vld [vmem:[#allocation4 + $0x24] ss:$8 sps:$4 sm:$0xff] (!%p2690_p8)  }
  0xd8   : > { %2850 = vmatprep.subr.bf16.mxu0 (!%p2690_p8), %v3488_v4  ;;  %v3548_v21 = vld [vmem:[#allocation10 + $0x40] sm:$0xff] (!%p2690_p8)   ;;  %v3550_v23 = vld [vmem:[#allocation10 + $0x48] sm:$0xff] (!%p2690_p8)   ;;  %v3552_v25 = vld [vmem:[#allocation10 + $0x50] sm:$0xff] (!%p2690_p8)  }
  0xd9   : > { %v3549_v22 = vld [vmem:[#allocation10] sm:$0xff]   ;;  %2958 = vmatprep.subr.bf16.mxu1 %v3548_v21  ;;  %v3551_v24 = vld [vmem:[#allocation10 + $0x8] sm:$0xff]   ;;  %v3508_v26 = vld [vmem:[#allocation4 + $0x20] ss:$8 sps:$4 sm:$0xff]  }
  0xda   : > { %2959 = vmatpush3.bf16.msra.mxu1 %v3549_v22  ;;  %v3553_v27 = vld [vmem:[#allocation10 + $0x10] sm:$0xff]   ;;  %v3554_v28 = vld [vmem:[#allocation10 + $0x58] sm:$0xff]   ;;  %v3509_v29 = vld [vmem:[#allocation4 + $0x34] ss:$8 sps:$4 sm:$0xff]  }
  0xdb   : > { %2851 = vmatpush3.bf16.msra.mxu0 %v3489_v5  ;;  %2960 = vmatprep.subr.bf16.mxu1 %v3550_v23  ;;  %v3555_v30 = vld [vmem:[#allocation10 + $0x18] sm:$0xff]   ;;  %v3556_v31 = vld [vmem:[#allocation10 + $0x60] sm:$0xff]   ;;  %v3558_v34 = vld [vmem:[#allocation10 + $0x68] sm:$0xff]  }
  0xdc   : > { %2852 = vmatprep.subr.bf16.mxu0 %v3490_v6  ;;  %v3557_v32 = vld [vmem:[#allocation10 + $0x20] sm:$0xff]   ;;  %v3512_v35 = vld [vmem:[#allocation4 + $0x44] ss:$8 sps:$4 sm:$0xff]   ;;  %v3559_v36 = vld [vmem:[#allocation10 + $0x28] sm:$0xff]  }
  0xdd   : > { %v3511_v33 = vld [vmem:[#allocation4 + $0x30] ss:$8 sps:$4 sm:$0xff]   ;;  %v3514_v37 = vld [vmem:[#allocation4 + $0x40] ss:$8 sps:$4 sm:$0xff]   ;;  %v3515_v38 = vld [vmem:[#allocation4 + $0x54] ss:$8 sps:$4 sm:$0xff]  }
  0xde   : > { %2961 = vmatpush3.bf16.msra.mxu1 %v3551_v24  ;;  %v3517_v39 = vld [vmem:[#allocation4 + $0x50] ss:$8 sps:$4 sm:$0xff]   ;;  %v3518_v40 = vld [vmem:[#allocation4 + $0x64] ss:$8 sps:$4 sm:$0xff]   ;;  %v3520_v41 = vld [vmem:[#allocation4 + $0x60] ss:$8 sps:$4 sm:$0xff]  }
  0xdf   : > { %2853 = vmatpush3.bf16.msra.mxu0 %v3491_v7  ;;  %2962 = vmatprep.subr.bf16.mxu1 %v3552_v25  ;;  %v3521_v42 = vld [vmem:[#allocation4 + $0x74] ss:$8 sps:$4 sm:$0xff]   ;;  %v3523_v43 = vld [vmem:[#allocation4 + $0x70] ss:$8 sps:$4 sm:$0xff]   ;;  %v3524_v44 = vld [vmem:[#allocation4 + $0x84] ss:$8 sps:$4 sm:$0xff]  }
  0xe0   : > { %2854 = vmatprep.subr.bf16.mxu0 %v3492_v8  ;;  %v3526_v45 = vld [vmem:[#allocation4 + $0x80] ss:$8 sps:$4 sm:$0xff]   ;;  %v3527_v46 = vld [vmem:[#allocation4 + $0x94] ss:$8 sps:$4 sm:$0xff]   ;;  %v3529_v47 = vld [vmem:[#allocation4 + $0x90] ss:$8 sps:$4 sm:$0xff]  }
  0xe1   : > { %v3530_v48 = vld [vmem:[#allocation4 + $0xa4] ss:$8 sps:$4 sm:$0xff]   ;;  %v3532_v49 = vld [vmem:[#allocation4 + $0xa0] ss:$8 sps:$4 sm:$0xff]   ;;  %v3533_v50 = vld [vmem:[#allocation4 + $0xb4] ss:$8 sps:$4 sm:$0xff]  }
  0xe2   : > { %2963 = vmatpush3.bf16.msra.mxu1 %v3553_v27  ;;  %v3560_v51 = vld [vmem:[#allocation10 + $0x70] sm:$0xff]   ;;  %v3535_v53 = vld [vmem:[#allocation4 + $0xb0] ss:$8 sps:$4 sm:$0xff]   ;;  %v3562_v55 = vld [vmem:[#allocation10 + $0x78] sm:$0xff]  }
  0xe3   : > { %2855 = vmatpush3.bf16.msra.mxu0 %v3493_v9  ;;  %2964 = vmatprep.subr.bf16.mxu1 %v3554_v28  ;;  %v3561_v52 = vld [vmem:[#allocation10 + $0x30] sm:$0xff]   ;;  %v3563_v56 = vld [vmem:[#allocation10 + $0x38] sm:$0xff]   ;;  %v3539_v59 = vld [vmem:[#allocation4 + $0xd4] ss:$8 sps:$4 sm:$0xff]  }
  0xe4   : > { %2856 = vmatprep.subr.bf16.mxu0 %v3494_v10  ;;  %v3536_v54 = vld [vmem:[#allocation4 + $0xc4] ss:$8 sps:$4 sm:$0xff]   ;;  %v3538_v58 = vld [vmem:[#allocation4 + $0xc0] ss:$8 sps:$4 sm:$0xff]   ;;  %v3541_v60 = vld [vmem:[#allocation4 + $0xd0] ss:$8 sps:$4 sm:$0xff]  }
  0xe5   : > { %v3564_v57 = vld [vmem:[#allocation7] sm:$0xff]   ;;  %v3545_v63 = vld [vmem:[#allocation4 + $0xf4] ss:$8 sps:$4 sm:$0xff]   ;;  %v3547_v0 = vld [vmem:[#allocation4 + $0xf0] ss:$8 sps:$4 sm:$0xff]  }
  0xe6   : > { %2965 = vmatpush3.bf16.msra.mxu1 %v3555_v30  ;;  %1305 = vmatprep.mubr.bf16.mxu1 %v3564_v57  ;;  %v3542_v61 = vld [vmem:[#allocation4 + $0xe4] ss:$8 sps:$4 sm:$0xff]   ;;  %v3544_v62 = vld [vmem:[#allocation4 + $0xe0] ss:$8 sps:$4 sm:$0xff]   ;;  %v3567_v23 = vld [vmem:[#allocation7 + $0x18] sm:$0xff]  }
  0xe7   : > { %2857 = vmatpush3.bf16.msra.mxu0 %v3495_v12  ;;  %2966 = vmatprep.subr.bf16.mxu1 %v3556_v31  ;;  %v3565_v7 = vld [vmem:[#allocation7 + $0x8] sm:$0xff]   ;;  %v3568_v31 = vld [vmem:[#allocation7 + $0x20] sm:$0xff]  }
  0xe8   : > { %2858 = vmatprep.subr.bf16.mxu0 %v3496_v13 }
  0xea   : > { %2967 = vmatpush3.bf16.msra.mxu1 %v3557_v32 }
  0xeb   : > { %2859 = vmatpush3.bf16.msra.mxu0 %v3497_v14  ;;  %2968 = vmatprep.subr.bf16.mxu1 %v3558_v34 }
  0xec   : > { %2860 = vmatprep.subr.bf16.mxu0 %v3498_v15  ;;  %v3566_v15 = vld [vmem:[#allocation7 + $0x10] sm:$0xff]  }
  0xee   : > { %2969 = vmatpush3.bf16.msra.mxu1 %v3559_v36 }
  0xef   : > { %2861 = vmatpush3.bf16.msra.mxu0 %v3499_v16  ;;  %2970 = vmatprep.subr.bf16.mxu1 %v3560_v51 }
  0xf2   : > { %862 = vmatmul.mubr.bf16.vlgmr.msra.gmra.mrb[0].mxu0 %v3500_v17  ;;  %2971 = vmatpush3.bf16.msra.mxu1 %v3561_v52 }
  0xf3   : > { %869 = vmatprep.mubr.bf16.mxu0 %v3503_v18  ;;  %2972 = vmatprep.subr.bf16.mxu1 %v3562_v55  ;;  %v3571_v55 = vld [vmem:[#allocation7 + $0x38] sm:$0xff]  }
  0xf6   : > { %2973 = vmatpush3.bf16.msra.mxu1 %v3563_v56 }
  0xfa   : > { %870 = vmatmul.mubr.bf16.gmra.mrb[4].mxu0 %v3505_v19 }
  0xfb   : > { %877 = vmatprep.mubr.bf16.mxu0 %v3506_v20 }
 0x102   : > { %878 = vmatmul.mubr.bf16.gmra.mrb[8].mxu0 %v3508_v26 }
 0x103   : > { %885 = vmatprep.mubr.bf16.mxu0 %v3509_v29 }
 0x10a   : > { %886 = vmatmul.mubr.bf16.gmra.mrb[12].mxu0 %v3511_v33 }
 0x10b   : > { %893 = vmatprep.mubr.bf16.mxu0 %v3512_v35 }
 0x112   : > { %894 = vmatmul.mubr.bf16.gmra.mrb[16].mxu0 %v3514_v37 }
 0x113   : > { %901 = vmatprep.mubr.bf16.mxu0 %v3515_v38 }
 0x11a   : > { %902 = vmatmul.mubr.bf16.gmra.mrb[20].mxu0 %v3517_v39  ;;  %v3569_v39 = vld [vmem:[#allocation7 + $0x28] sm:$0xff]  }
 0x11b   : > { %909 = vmatprep.mubr.bf16.mxu0 %v3518_v40 }
 0x122   : > { %910 = vmatmul.mubr.bf16.gmra.mrb[24].mxu0 %v3520_v41 }
 0x123   : > { %917 = vmatprep.mubr.bf16.mxu0 %v3521_v42 }
 0x12a   : > { %918 = vmatmul.mubr.bf16.gmra.mrb[28].mxu0 %v3523_v43 }
 0x12b   : > { %925 = vmatprep.mubr.bf16.mxu0 %v3524_v44 }
 0x132   : > { %926 = vmatmul.mubr.bf16.gmra.mrb[32].mxu0 %v3526_v45 }
 0x133   : > { %933 = vmatprep.mubr.bf16.mxu0 %v3527_v46 }
 0x13a   : > { %934 = vmatmul.mubr.bf16.gmra.mrb[36].mxu0 %v3529_v47  ;;  %v3570_v47 = vld [vmem:[#allocation7 + $0x30] sm:$0xff]  }
 0x13b   : > { %941 = vmatprep.mubr.bf16.mxu0 %v3530_v48 }
 0x142   : > { %942 = vmatmul.mubr.bf16.gmra.mrb[40].mxu0 %v3532_v49 }
 0x143   : > { %949 = vmatprep.mubr.bf16.mxu0 %v3533_v50 }
 0x14a   : > { %950 = vmatmul.mubr.bf16.gmra.mrb[44].mxu0 %v3535_v53 }
 0x14b   : > { %957 = vmatprep.mubr.bf16.mxu0 %v3536_v54 }
 0x152   : > { %958 = vmatmul.mubr.bf16.gmra.mrb[48].mxu0 %v3538_v58 }
 0x153   : > { %965 = vmatprep.mubr.bf16.mxu0 %v3539_v59 }
 0x15a   : > { %966 = vmatmul.mubr.bf16.gmra.mrb[52].mxu0 %v3541_v60 }
 0x15b   : > { %973 = vmatprep.mubr.bf16.mxu0 %v3542_v61 }
 0x162   : > { %974 = vmatmul.mubr.bf16.gmra.mrb[56].mxu0 %v3544_v62 }
 0x163   : > { %981 = vmatprep.mubr.bf16.mxu0 %v3545_v63  ;;  %v3572_v63 = vld [vmem:[#allocation7 + $0x40] sm:$0xff]  }
 0x16a   : > { %982 = vmatmul.mubr.bf16.gmra.mrb[60].mxu0 %v3547_v0 }
 0x1c5   : > { %v2862_v1 = vpop.f32.mrb[0].mxu0 }
 0x1c6   : > { %v2863_v2 = vpop.f32.mrb[1].mxu0 }
 0x1c7   : > { %v2864_v3 = vadd.f32 %v2863_v2, %v2862_v1  ;;  %v2865_v4 = vpop.f32.mrb[2].mxu0 }
 0x1c8   : > { %v2866_v5 = vpop.f32.mrb[3].mxu0 }
 0x1c9   : > { %v2867_v6 = vadd.f32 %v2866_v5, %v2865_v4 }
 0x1cb   : > { %v1026_v8 = vpack.c.bf16 %v2867_v6, %v2864_v3 }
 0x1cd   : > { %v2868_v9 = vpop.f32.mrb[4].mxu0  ;;  %1306 = vmatmul.mubr.bf16.vlgmr.msra.gmra.mrb[0].mxu1 %v1026_v8 }
 0x1ce   : > { %v2869_v10 = vpop.f32.mrb[5].mxu0  ;;  %1313 = vmatprep.mubr.bf16.mxu1 %v3565_v7  ;;  %v3573_v7 = vld [vmem:[#allocation7 + $0x48] sm:$0xff]  }
 0x1cf   : > { %v2870_v11 = vadd.f32 %v2869_v10, %v2868_v9  ;;  %v2871_v12 = vpop.f32.mrb[6].mxu0 }
 0x1d0   : > { %v2872_v13 = vpop.f32.mrb[7].mxu0 }
 0x1d1   : > { %v2873_v14 = vadd.f32 %v2872_v13, %v2871_v12 }
 0x1d3   : > { %v1027_v16 = vpack.c.bf16 %v2873_v14, %v2870_v11 }
 0x1d5   : > { %v2874_v17 = vpop.f32.mrb[8].mxu0  ;;  %1314 = vmatmul.mubr.bf16.gmra.mrb[4].mxu1 %v1027_v16 }
 0x1d6   : > { %v2875_v18 = vpop.f32.mrb[9].mxu0  ;;  %1321 = vmatprep.mubr.bf16.mxu1 %v3566_v15  ;;  %v3574_v15 = vld [vmem:[#allocation7 + $0x50] sm:$0xff]  }
 0x1d7   : > { %v2876_v19 = vadd.f32 %v2875_v18, %v2874_v17  ;;  %v2877_v20 = vpop.f32.mrb[10].mxu0 }
 0x1d8   : > { %v2878_v21 = vpop.f32.mrb[11].mxu0 }
 0x1d9   : > { %v2879_v22 = vadd.f32 %v2878_v21, %v2877_v20 }
 0x1db   : > { %v1028_v24 = vpack.c.bf16 %v2879_v22, %v2876_v19 }
 0x1dd   : > { %v2880_v25 = vpop.f32.mrb[12].mxu0  ;;  %1322 = vmatmul.mubr.bf16.gmra.mrb[8].mxu1 %v1028_v24 }
 0x1de   : > { %v2881_v26 = vpop.f32.mrb[13].mxu0  ;;  %1329 = vmatprep.mubr.bf16.mxu1 %v3567_v23  ;;  %v3575_v23 = vld [vmem:[#allocation7 + $0x58] sm:$0xff]  }
 0x1df   : > { %v2882_v27 = vadd.f32 %v2881_v26, %v2880_v25  ;;  %v2883_v28 = vpop.f32.mrb[14].mxu0 }
 0x1e0   : > { %v2884_v29 = vpop.f32.mrb[15].mxu0 }
 0x1e1   : > { %v2885_v30 = vadd.f32 %v2884_v29, %v2883_v28 }
 0x1e3   : > { %v1029_v32 = vpack.c.bf16 %v2885_v30, %v2882_v27 }
 0x1e5   : > { %v2886_v33 = vpop.f32.mrb[16].mxu0  ;;  %1330 = vmatmul.mubr.bf16.gmra.mrb[12].mxu1 %v1029_v32 }
 0x1e6   : > { %v2887_v34 = vpop.f32.mrb[17].mxu0  ;;  %1337 = vmatprep.mubr.bf16.mxu1 %v3568_v31  ;;  %v3576_v31 = vld [vmem:[#allocation7 + $0x60] sm:$0xff]  }
 0x1e7   : > { %v2888_v35 = vadd.f32 %v2887_v34, %v2886_v33  ;;  %v2889_v36 = vpop.f32.mrb[18].mxu0 }
 0x1e8   : > { %v2890_v37 = vpop.f32.mrb[19].mxu0 }
 0x1e9   : > { %v2891_v38 = vadd.f32 %v2890_v37, %v2889_v36 }
 0x1eb   : > { %v1030_v40 = vpack.c.bf16 %v2891_v38, %v2888_v35 }
 0x1ed   : > { %v2892_v41 = vpop.f32.mrb[20].mxu0  ;;  %1338 = vmatmul.mubr.bf16.gmra.mrb[16].mxu1 %v1030_v40 }
 0x1ee   : > { %v2893_v42 = vpop.f32.mrb[21].mxu0  ;;  %1345 = vmatprep.mubr.bf16.mxu1 %v3569_v39  ;;  %v3577_v39 = vld [vmem:[#allocation7 + $0x68] sm:$0xff]  }
 0x1ef   : > { %v2894_v43 = vadd.f32 %v2893_v42, %v2892_v41  ;;  %v2895_v44 = vpop.f32.mrb[22].mxu0 }
 0x1f0   : > { %v2896_v45 = vpop.f32.mrb[23].mxu0 }
 0x1f1   : > { %v2897_v46 = vadd.f32 %v2896_v45, %v2895_v44 }
 0x1f3   : > { %v1031_v48 = vpack.c.bf16 %v2897_v46, %v2894_v43 }
 0x1f5   : > { %v2898_v49 = vpop.f32.mrb[24].mxu0  ;;  %1346 = vmatmul.mubr.bf16.gmra.mrb[20].mxu1 %v1031_v48 }
 0x1f6   : > { %v2899_v50 = vpop.f32.mrb[25].mxu0  ;;  %1353 = vmatprep.mubr.bf16.mxu1 %v3570_v47  ;;  %v3578_v47 = vld [vmem:[#allocation7 + $0x70] sm:$0xff]  }
 0x1f7   : > { %v2900_v51 = vadd.f32 %v2899_v50, %v2898_v49  ;;  %v2901_v52 = vpop.f32.mrb[26].mxu0 }
 0x1f8   : > { %v2902_v53 = vpop.f32.mrb[27].mxu0 }
 0x1f9   : > { %v2903_v54 = vadd.f32 %v2902_v53, %v2901_v52 }
 0x1fb   : > { %v1032_v56 = vpack.c.bf16 %v2903_v54, %v2900_v51 }
 0x1fd   : > { %v2904_v57 = vpop.f32.mrb[28].mxu0  ;;  %1354 = vmatmul.mubr.bf16.gmra.mrb[24].mxu1 %v1032_v56 }
 0x1fe   : > { %v2905_v58 = vpop.f32.mrb[29].mxu0  ;;  %1361 = vmatprep.mubr.bf16.mxu1 %v3571_v55  ;;  %v3579_v55 = vld [vmem:[#allocation7 + $0x78] sm:$0xff]  }
 0x1ff   : > { %v2906_v59 = vadd.f32 %v2905_v58, %v2904_v57  ;;  %v2907_v60 = vpop.f32.mrb[30].mxu0 }
 0x200   : > { %v2908_v61 = vpop.f32.mrb[31].mxu0 }
 0x201   : > { %v2909_v62 = vadd.f32 %v2908_v61, %v2907_v60 }
 0x203   : > { %v1033_v0 = vpack.c.bf16 %v2909_v62, %v2906_v59 }
 0x205   : > { %v2910_v1 = vpop.f32.mrb[32].mxu0  ;;  %1362 = vmatmul.mubr.bf16.gmra.mrb[28].mxu1 %v1033_v0 }
 0x206   : > { %v2911_v2 = vpop.f32.mrb[33].mxu0  ;;  %1369 = vmatprep.mubr.bf16.mxu1 %v3572_v63 }
 0x207   : > { %v2912_v3 = vadd.f32 %v2911_v2, %v2910_v1  ;;  %v2913_v4 = vpop.f32.mrb[34].mxu0  ;;  %v4231_v1 = vld [vmem:[%s4453_s4] ss:$0 sm:$0xff] }
 0x208   : > { %v2914_v5 = vpop.f32.mrb[35].mxu0 }
 0x209   : > { %v2915_v6 = vadd.f32 %v2914_v5, %v2913_v4 }
 0x20b   : > { %v1034_v8 = vpack.c.bf16 %v2915_v6, %v2912_v3 }
 0x20d   : > { %v2916_v9 = vpop.f32.mrb[36].mxu0  ;;  %1370 = vmatmul.mubr.bf16.gmra.mrb[32].mxu1 %v1034_v8 }
 0x20e   : > { %v2917_v10 = vpop.f32.mrb[37].mxu0  ;;  %1377 = vmatprep.mubr.bf16.mxu1 %v3573_v7 }
 0x20f   : > { %v2918_v11 = vadd.f32 %v2917_v10, %v2916_v9  ;;  %v2919_v12 = vpop.f32.mrb[38].mxu0 }
 0x210   : > { %v2920_v13 = vpop.f32.mrb[39].mxu0 }
 0x211   : > { %v2921_v14 = vadd.f32 %v2920_v13, %v2919_v12 }
 0x213   : > { %v1035_v16 = vpack.c.bf16 %v2921_v14, %v2918_v11 }
 0x215   : > { %v2922_v17 = vpop.f32.mrb[40].mxu0  ;;  %1378 = vmatmul.mubr.bf16.gmra.mrb[36].mxu1 %v1035_v16 }
 0x216   : > { %v2923_v18 = vpop.f32.mrb[41].mxu0  ;;  %1385 = vmatprep.mubr.bf16.mxu1 %v3574_v15 }
 0x217   : > { %v2924_v19 = vadd.f32 %v2923_v18, %v2922_v17  ;;  %v2925_v20 = vpop.f32.mrb[42].mxu0 }
 0x218   : > { %v2926_v21 = vpop.f32.mrb[43].mxu0 }
 0x219   : > { %v2927_v22 = vadd.f32 %v2926_v21, %v2925_v20 }
 0x21b   : > { %v1036_v24 = vpack.c.bf16 %v2927_v22, %v2924_v19 }
 0x21d   : > { %v2928_v25 = vpop.f32.mrb[44].mxu0  ;;  %1386 = vmatmul.mubr.bf16.gmra.mrb[40].mxu1 %v1036_v24 }
 0x21e   : > { %v2929_v26 = vpop.f32.mrb[45].mxu0  ;;  %1393 = vmatprep.mubr.bf16.mxu1 %v3575_v23 }
 0x21f   : > { %v2930_v27 = vadd.f32 %v2929_v26, %v2928_v25  ;;  %v2931_v28 = vpop.f32.mrb[46].mxu0 }
 0x220   : > { %v2932_v29 = vpop.f32.mrb[47].mxu0 }
 0x221   : > { %v2933_v30 = vadd.f32 %v2932_v29, %v2931_v28 }
 0x223   : > { %v1037_v32 = vpack.c.bf16 %v2933_v30, %v2930_v27 }
 0x225   : > { %v2934_v33 = vpop.f32.mrb[48].mxu0  ;;  %1394 = vmatmul.mubr.bf16.gmra.mrb[44].mxu1 %v1037_v32 }
 0x226   : > { %v2935_v34 = vpop.f32.mrb[49].mxu0  ;;  %1401 = vmatprep.mubr.bf16.mxu1 %v3576_v31 }
 0x227   : > { %v2936_v35 = vadd.f32 %v2935_v34, %v2934_v33  ;;  %v2937_v36 = vpop.f32.mrb[50].mxu0 }
 0x228   : > { %v2938_v37 = vpop.f32.mrb[51].mxu0 }
 0x229   : > { %v2939_v38 = vadd.f32 %v2938_v37, %v2937_v36 }
 0x22b   : > { %v1038_v40 = vpack.c.bf16 %v2939_v38, %v2936_v35 }
 0x22d   : > { %v2940_v41 = vpop.f32.mrb[52].mxu0  ;;  %1402 = vmatmul.mubr.bf16.gmra.mrb[48].mxu1 %v1038_v40 }
 0x22e   : > { %v2941_v42 = vpop.f32.mrb[53].mxu0  ;;  %1409 = vmatprep.mubr.bf16.mxu1 %v3577_v39 }
 0x22f   : > { %v2942_v43 = vadd.f32 %v2941_v42, %v2940_v41  ;;  %v2943_v44 = vpop.f32.mrb[54].mxu0 }
 0x230   : > { %v2944_v45 = vpop.f32.mrb[55].mxu0 }
 0x231   : > { %v2945_v46 = vadd.f32 %v2944_v45, %v2943_v44 }
 0x233   : > { %v1039_v48 = vpack.c.bf16 %v2945_v46, %v2942_v43 }
 0x235   : > { %v2946_v49 = vpop.f32.mrb[56].mxu0  ;;  %1410 = vmatmul.mubr.bf16.gmra.mrb[52].mxu1 %v1039_v48 }
 0x236   : > { %v2947_v50 = vpop.f32.mrb[57].mxu0  ;;  %1417 = vmatprep.mubr.bf16.mxu1 %v3578_v47 }
 0x237   : > { %v2948_v51 = vadd.f32 %v2947_v50, %v2946_v49  ;;  %v2949_v52 = vpop.f32.mrb[58].mxu0 }
 0x238   : > { %v2950_v53 = vpop.f32.mrb[59].mxu0 }
 0x239   : > { %v2951_v54 = vadd.f32 %v2950_v53, %v2949_v52 }
 0x23b   : > { %v1040_v56 = vpack.c.bf16 %v2951_v54, %v2948_v51 }
 0x23d   : > { %v2952_v57 = vpop.f32.mrb[60].mxu0  ;;  %1418 = vmatmul.mubr.bf16.gmra.mrb[56].mxu1 %v1040_v56 }
 0x23e   : > { %v2953_v58 = vpop.f32.mrb[61].mxu0  ;;  %1425 = vmatprep.mubr.bf16.mxu1 %v3579_v55 }
 0x23f   : > { %v2954_v59 = vadd.f32 %v2953_v58, %v2952_v57  ;;  %v2955_v60 = vpop.f32.mrb[62].mxu0 }
 0x240   : > { %v2956_v61 = vpop.f32.mrb[63].mxu0 }
 0x241   : > { %v2957_v62 = vadd.f32 %v2956_v61, %v2955_v60 }
 0x243   : > { %v1041_v63 = vpack.c.bf16 %v2957_v62, %v2954_v59 }
 0x245   : > { %1426 = vmatmul.mubr.bf16.gmra.mrb[60].mxu1 %v1041_v63 }
 0x2a0   : > { %v2974_v0 = vpop.f32.mrb[0].mxu1 }
 0x2a1   : > { %v2975_v2 = vpop.f32.mrb[1].mxu1 }
 0x2a2   : > { %v2976_v3 = vadd.f32 %v2975_v2, %v2974_v0  ;;  %v2977_v4 = vpop.f32.mrb[2].mxu1 }
 0x2a3   : > { %v2978_v5 = vpop.f32.mrb[3].mxu1 }
 0x2a4   : > { %v1308_v6 = vadd.f32 %v2976_v3, %v4231_v1  ;;  %v2979_v7 = vadd.f32 %v2978_v5, %v2977_v4 }
 0x2a6   : > { %v1311_v8 = vadd.f32 %v2979_v7, %v4231_v1  ;;  %v1434_v9 = vmax.f32 %v1308_v6, 0.0 }
 0x2a8   : > { %v1435_v10 = vmax.f32 %v1311_v8, 0.0  ;;  %v2980_v11 = vpop.f32.mrb[4].mxu1 }
 0x2a9   : > { %v2981_v12 = vpop.f32.mrb[5].mxu1 }
 0x2aa   : > { %v1466_v13 = vpack.c.bf16 %v1435_v10, %v1434_v9  ;;  %v2982_v14 = vadd.f32 %v2981_v12, %v2980_v11  ;;  %v2983_v15 = vpop.f32.mrb[6].mxu1 }
 0x2ab   : > { %v2984_v16 = vpop.f32.mrb[7].mxu1 }
 0x2ac   : > { %1486 = vst [vmem:[#allocation2] sm:$0xff] %v1466_v13  ;;  %v1316_v17 = vadd.f32 %v2982_v14, %v4231_v1  ;;  %v2985_v18 = vadd.f32 %v2984_v16, %v2983_v15 }
 0x2ae   : > { %v1319_v19 = vadd.f32 %v2985_v18, %v4231_v1  ;;  %v1436_v20 = vmax.f32 %v1316_v17, 0.0 }
 0x2b0   : > { %v1437_v21 = vmax.f32 %v1319_v19, 0.0  ;;  %v2986_v22 = vpop.f32.mrb[8].mxu1 }
 0x2b1   : > { %v2987_v23 = vpop.f32.mrb[9].mxu1 }
 0x2b2   : > { %v1467_v24 = vpack.c.bf16 %v1437_v21, %v1436_v20  ;;  %v2988_v25 = vadd.f32 %v2987_v23, %v2986_v22  ;;  %v2989_v26 = vpop.f32.mrb[10].mxu1 }
 0x2b3   : > { %v2990_v27 = vpop.f32.mrb[11].mxu1 }
 0x2b4   : > { %1487 = vst [vmem:[#allocation2 + $0x8] sm:$0xff] %v1467_v24  ;;  %v1324_v28 = vadd.f32 %v2988_v25, %v4231_v1  ;;  %v2991_v29 = vadd.f32 %v2990_v27, %v2989_v26 }
 0x2b6   : > { %v1327_v30 = vadd.f32 %v2991_v29, %v4231_v1  ;;  %v1438_v31 = vmax.f32 %v1324_v28, 0.0 }
 0x2b8   : > { %v1439_v32 = vmax.f32 %v1327_v30, 0.0  ;;  %v2992_v33 = vpop.f32.mrb[12].mxu1 }
 0x2b9   : > { %v2993_v34 = vpop.f32.mrb[13].mxu1 }
 0x2ba   : > { %v1468_v35 = vpack.c.bf16 %v1439_v32, %v1438_v31  ;;  %v2994_v36 = vadd.f32 %v2993_v34, %v2992_v33  ;;  %v2995_v37 = vpop.f32.mrb[14].mxu1 }
 0x2bb   : > { %v2996_v38 = vpop.f32.mrb[15].mxu1 }
 0x2bc   : > { %1488 = vst [vmem:[#allocation2 + $0x10] sm:$0xff] %v1468_v35  ;;  %v1332_v39 = vadd.f32 %v2994_v36, %v4231_v1  ;;  %v2997_v40 = vadd.f32 %v2996_v38, %v2995_v37 }
 0x2be   : > { %v1335_v41 = vadd.f32 %v2997_v40, %v4231_v1  ;;  %v1440_v42 = vmax.f32 %v1332_v39, 0.0 }
 0x2c0   : > { %v1441_v43 = vmax.f32 %v1335_v41, 0.0  ;;  %v2998_v44 = vpop.f32.mrb[16].mxu1 }
 0x2c1   : > { %v2999_v45 = vpop.f32.mrb[17].mxu1 }
 0x2c2   : > { %v1469_v46 = vpack.c.bf16 %v1441_v43, %v1440_v42  ;;  %v3000_v47 = vadd.f32 %v2999_v45, %v2998_v44  ;;  %v3001_v48 = vpop.f32.mrb[18].mxu1 }
 0x2c3   : > { %v3002_v49 = vpop.f32.mrb[19].mxu1 }
 0x2c4   : > { %1489 = vst [vmem:[#allocation2 + $0x18] sm:$0xff] %v1469_v46  ;;  %v1340_v50 = vadd.f32 %v3000_v47, %v4231_v1  ;;  %v3003_v51 = vadd.f32 %v3002_v49, %v3001_v48 }
 0x2c6   : > { %v1343_v52 = vadd.f32 %v3003_v51, %v4231_v1  ;;  %v1442_v53 = vmax.f32 %v1340_v50, 0.0 }
 0x2c8   : > { %v1443_v54 = vmax.f32 %v1343_v52, 0.0  ;;  %v3004_v55 = vpop.f32.mrb[20].mxu1 }
 0x2c9   : > { %v3005_v56 = vpop.f32.mrb[21].mxu1 }
 0x2ca   : > { %v1470_v57 = vpack.c.bf16 %v1443_v54, %v1442_v53  ;;  %v3006_v58 = vadd.f32 %v3005_v56, %v3004_v55  ;;  %v3007_v59 = vpop.f32.mrb[22].mxu1 }
 0x2cb   : > { %v3008_v60 = vpop.f32.mrb[23].mxu1 }
 0x2cc   : > { %1490 = vst [vmem:[#allocation2 + $0x20] sm:$0xff] %v1470_v57  ;;  %v1348_v61 = vadd.f32 %v3006_v58, %v4231_v1  ;;  %v3009_v62 = vadd.f32 %v3008_v60, %v3007_v59 }
 0x2ce   : > { %v1351_v63 = vadd.f32 %v3009_v62, %v4231_v1  ;;  %v1444_v0 = vmax.f32 %v1348_v61, 0.0 }
 0x2d0   : > { %v1445_v2 = vmax.f32 %v1351_v63, 0.0  ;;  %v3010_v3 = vpop.f32.mrb[24].mxu1 }
 0x2d1   : > { %v3011_v4 = vpop.f32.mrb[25].mxu1 }
 0x2d2   : > { %v1471_v5 = vpack.c.bf16 %v1445_v2, %v1444_v0  ;;  %v3012_v6 = vadd.f32 %v3011_v4, %v3010_v3  ;;  %v3013_v7 = vpop.f32.mrb[26].mxu1 }
 0x2d3   : > { %v3014_v8 = vpop.f32.mrb[27].mxu1 }
 0x2d4   : > { %1491 = vst [vmem:[#allocation2 + $0x28] sm:$0xff] %v1471_v5  ;;  %v1356_v9 = vadd.f32 %v3012_v6, %v4231_v1  ;;  %v3015_v10 = vadd.f32 %v3014_v8, %v3013_v7 }
 0x2d6   : > { %v1359_v11 = vadd.f32 %v3015_v10, %v4231_v1  ;;  %v1446_v12 = vmax.f32 %v1356_v9, 0.0 }
 0x2d8   : > { %v1447_v13 = vmax.f32 %v1359_v11, 0.0  ;;  %v3016_v14 = vpop.f32.mrb[28].mxu1 }
 0x2d9   : > { %v3017_v15 = vpop.f32.mrb[29].mxu1 }
 0x2da   : > { %v1472_v16 = vpack.c.bf16 %v1447_v13, %v1446_v12  ;;  %v3018_v17 = vadd.f32 %v3017_v15, %v3016_v14  ;;  %v3019_v18 = vpop.f32.mrb[30].mxu1 }
 0x2db   : > { %v3020_v19 = vpop.f32.mrb[31].mxu1 }
 0x2dc   : > { %1492 = vst [vmem:[#allocation2 + $0x30] sm:$0xff] %v1472_v16  ;;  %v1364_v20 = vadd.f32 %v3018_v17, %v4231_v1  ;;  %v3021_v21 = vadd.f32 %v3020_v19, %v3019_v18 }
 0x2de   : > { %v1367_v22 = vadd.f32 %v3021_v21, %v4231_v1  ;;  %v1448_v23 = vmax.f32 %v1364_v20, 0.0 }
 0x2e0   : > { %v1449_v24 = vmax.f32 %v1367_v22, 0.0  ;;  %v3022_v25 = vpop.f32.mrb[32].mxu1 }
 0x2e1   : > { %v3023_v26 = vpop.f32.mrb[33].mxu1 }
 0x2e2   : > { %v1473_v27 = vpack.c.bf16 %v1449_v24, %v1448_v23  ;;  %v3024_v28 = vadd.f32 %v3023_v26, %v3022_v25  ;;  %v3025_v29 = vpop.f32.mrb[34].mxu1 }
 0x2e3   : > { %v3026_v30 = vpop.f32.mrb[35].mxu1 }
 0x2e4   : > { %1493 = vst [vmem:[#allocation2 + $0x38] sm:$0xff] %v1473_v27  ;;  %v1372_v31 = vadd.f32 %v3024_v28, %v4231_v1  ;;  %v3027_v32 = vadd.f32 %v3026_v30, %v3025_v29 }
 0x2e6   : > { %v1375_v33 = vadd.f32 %v3027_v32, %v4231_v1  ;;  %v1450_v34 = vmax.f32 %v1372_v31, 0.0 }
 0x2e8   : > { %v1451_v35 = vmax.f32 %v1375_v33, 0.0  ;;  %v3028_v36 = vpop.f32.mrb[36].mxu1 }
 0x2e9   : > { %v3029_v37 = vpop.f32.mrb[37].mxu1 }
 0x2ea   : > { %v1474_v38 = vpack.c.bf16 %v1451_v35, %v1450_v34  ;;  %v3030_v39 = vadd.f32 %v3029_v37, %v3028_v36  ;;  %v3031_v40 = vpop.f32.mrb[38].mxu1 }
 0x2eb   : > { %v3032_v41 = vpop.f32.mrb[39].mxu1 }
 0x2ec   : > { %1494 = vst [vmem:[#allocation2 + $0x40] sm:$0xff] %v1474_v38  ;;  %v1380_v42 = vadd.f32 %v3030_v39, %v4231_v1  ;;  %v3033_v43 = vadd.f32 %v3032_v41, %v3031_v40 }
 0x2ee   : > { %v1383_v44 = vadd.f32 %v3033_v43, %v4231_v1  ;;  %v1452_v45 = vmax.f32 %v1380_v42, 0.0 }
 0x2f0   : > { %v1453_v46 = vmax.f32 %v1383_v44, 0.0  ;;  %v3034_v47 = vpop.f32.mrb[40].mxu1 }
 0x2f1   : > { %v3035_v48 = vpop.f32.mrb[41].mxu1 }
 0x2f2   : > { %v1475_v49 = vpack.c.bf16 %v1453_v46, %v1452_v45  ;;  %v3036_v50 = vadd.f32 %v3035_v48, %v3034_v47  ;;  %v3037_v51 = vpop.f32.mrb[42].mxu1 }
 0x2f3   : > { %v3038_v52 = vpop.f32.mrb[43].mxu1 }
 0x2f4   : > { %1495 = vst [vmem:[#allocation2 + $0x48] sm:$0xff] %v1475_v49  ;;  %v1388_v53 = vadd.f32 %v3036_v50, %v4231_v1  ;;  %v3039_v54 = vadd.f32 %v3038_v52, %v3037_v51 }
 0x2f6   : > { %v1391_v55 = vadd.f32 %v3039_v54, %v4231_v1  ;;  %v1454_v56 = vmax.f32 %v1388_v53, 0.0 }
 0x2f8   : > { %v1455_v57 = vmax.f32 %v1391_v55, 0.0  ;;  %v3040_v58 = vpop.f32.mrb[44].mxu1 }
 0x2f9   : > { %v3041_v59 = vpop.f32.mrb[45].mxu1 }
 0x2fa   : > { %v1476_v60 = vpack.c.bf16 %v1455_v57, %v1454_v56  ;;  %v3042_v61 = vadd.f32 %v3041_v59, %v3040_v58  ;;  %v3043_v62 = vpop.f32.mrb[46].mxu1 }
 0x2fb   : > { %v3044_v63 = vpop.f32.mrb[47].mxu1 }
 0x2fc   : > { %1496 = vst [vmem:[#allocation2 + $0x50] sm:$0xff] %v1476_v60  ;;  %v1396_v0 = vadd.f32 %v3042_v61, %v4231_v1  ;;  %v3045_v2 = vadd.f32 %v3044_v63, %v3043_v62 }
 0x2fe   : > { %v1399_v3 = vadd.f32 %v3045_v2, %v4231_v1  ;;  %v1456_v4 = vmax.f32 %v1396_v0, 0.0 }
 0x300   : > { %v1457_v5 = vmax.f32 %v1399_v3, 0.0  ;;  %v3046_v6 = vpop.f32.mrb[48].mxu1 }
 0x301   : > { %v3047_v7 = vpop.f32.mrb[49].mxu1 }
 0x302   : > { %v1477_v8 = vpack.c.bf16 %v1457_v5, %v1456_v4  ;;  %v3048_v9 = vadd.f32 %v3047_v7, %v3046_v6  ;;  %v3049_v10 = vpop.f32.mrb[50].mxu1 }
 0x303   : > { %v3050_v11 = vpop.f32.mrb[51].mxu1 }
 0x304   : > { %1497 = vst [vmem:[#allocation2 + $0x58] sm:$0xff] %v1477_v8  ;;  %v1404_v12 = vadd.f32 %v3048_v9, %v4231_v1  ;;  %v3051_v13 = vadd.f32 %v3050_v11, %v3049_v10 }
 0x306   : > { %v1407_v14 = vadd.f32 %v3051_v13, %v4231_v1  ;;  %v1458_v15 = vmax.f32 %v1404_v12, 0.0 }
 0x308   : > { %v1459_v16 = vmax.f32 %v1407_v14, 0.0  ;;  %v3052_v17 = vpop.f32.mrb[52].mxu1 }
 0x309   : > { %v3053_v18 = vpop.f32.mrb[53].mxu1 }
 0x30a   : > { %v1478_v19 = vpack.c.bf16 %v1459_v16, %v1458_v15  ;;  %v3054_v20 = vadd.f32 %v3053_v18, %v3052_v17  ;;  %v3055_v21 = vpop.f32.mrb[54].mxu1 }
 0x30b   : > { %v3056_v22 = vpop.f32.mrb[55].mxu1 }
 0x30c   : > { %1498 = vst [vmem:[#allocation2 + $0x60] sm:$0xff] %v1478_v19  ;;  %v1412_v23 = vadd.f32 %v3054_v20, %v4231_v1  ;;  %v3057_v24 = vadd.f32 %v3056_v22, %v3055_v21 }
 0x30e   : > { %v1415_v25 = vadd.f32 %v3057_v24, %v4231_v1  ;;  %v1460_v26 = vmax.f32 %v1412_v23, 0.0 }
 0x310   : > { %v1461_v27 = vmax.f32 %v1415_v25, 0.0  ;;  %v3058_v28 = vpop.f32.mrb[56].mxu1 }
 0x311   : > { %v3059_v29 = vpop.f32.mrb[57].mxu1 }
 0x312   : > { %v1479_v30 = vpack.c.bf16 %v1461_v27, %v1460_v26  ;;  %v3060_v31 = vadd.f32 %v3059_v29, %v3058_v28  ;;  %v3061_v32 = vpop.f32.mrb[58].mxu1 }
 0x313   : > { %v3062_v33 = vpop.f32.mrb[59].mxu1 }
 0x314   : > { %1499 = vst [vmem:[#allocation2 + $0x68] sm:$0xff] %v1479_v30  ;;  %v1420_v34 = vadd.f32 %v3060_v31, %v4231_v1  ;;  %v3063_v35 = vadd.f32 %v3062_v33, %v3061_v32 }
 0x316   : > { %v1423_v36 = vadd.f32 %v3063_v35, %v4231_v1  ;;  %v1462_v37 = vmax.f32 %v1420_v34, 0.0 }
 0x318   : > { %v1463_v38 = vmax.f32 %v1423_v36, 0.0  ;;  %v3064_v39 = vpop.f32.mrb[60].mxu1 }
 0x319   : > { %v3065_v40 = vpop.f32.mrb[61].mxu1 }
 0x31a   : > { %v1480_v41 = vpack.c.bf16 %v1463_v38, %v1462_v37  ;;  %v3066_v42 = vadd.f32 %v3065_v40, %v3064_v39  ;;  %v3067_v43 = vpop.f32.mrb[62].mxu1 }
 0x31b   : > { %v3068_v44 = vpop.f32.mrb[63].mxu1 }
 0x31c   : > { %1500 = vst [vmem:[#allocation2 + $0x70] sm:$0xff] %v1480_v41  ;;  %v1428_v45 = vadd.f32 %v3066_v42, %v4231_v1  ;;  %v3069_v46 = vadd.f32 %v3068_v44, %v3067_v43 }
 0x31e   : > { %v1431_v47 = vadd.f32 %v3069_v46, %v4231_v1  ;;  %v1464_v48 = vmax.f32 %v1428_v45, 0.0 }
 0x320   : > { %v1465_v49 = vmax.f32 %v1431_v47, 0.0 }
 0x322   : > { %v1481_v50 = vpack.c.bf16 %v1465_v49, %v1464_v48 }
 0x324   : > { %1501 = vst [vmem:[#allocation2 + $0x78] sm:$0xff] %v1481_v50 }
 0x325 PF: > { %p2772_p6 = scmp.ne.s32.totalorder %s3926_s17, 1 }
 0x326   : > { %v4266_v51 = vld [vmem:[#allocation2 + $0x40] sm:$0xff] (!%p2772_p6)  ;;  %v4268_v53 = vld [vmem:[#allocation2 + $0x48] sm:$0xff] (!%p2772_p6)  ;;  %v4274_v54 = vld [vmem:[#allocation2 + $0x50] sm:$0xff] (!%p2772_p6)  ;;  %vm3948_vm0 = vmmov (!%p2772_p6), 0   ;;  %s4489_s10 = sld [smem:[#allocation27_spill]] (!%p2772_p6) }
 0x327   : > { %1505 = sbr.rel (%p2772_p6) target bundleno = 2055 (0x807), region = 100  ;;  %v1543_v52 = vld [vmem:[#allocation2] sm:$0xff] (!%p2772_p6)  ;;  %3070 = vmatprep.subr.bf16.mxu0 (!%p2772_p6), %v4266_v51  ;;  %v4272_v1 = vld [vmem:[#allocation2 + $0x8] sm:$0xff] (!%p2772_p6)  ;;  %v4278_v56 = vld [vmem:[#allocation2 + $0x10] sm:$0xff] (!%p2772_p6) }
 0x328   : > { %2083 = vmatprep.mubr.bf16.mxu1 (!%p2772_p6), %v1543_v52  ;;  %3071 = vmatpush3.bf16.msra.mxu0 (!%p2772_p6), %v1543_v52  ;;  %v3582_v55 = vld [vmem:[#allocation4 + $0x4] ss:$8 sps:$4 sm:$0xff] (!%p2772_p6)   ;;  %v4280_v57 = vld [vmem:[#allocation2 + $0x58] sm:$0xff] (!%p2772_p6)  ;;  %v4298_v63 = vld [vmem:[#allocation2 + $0x70] sm:$0xff] (!%p2772_p6) }
 0x329   : > { %3072 = vmatprep.subr.bf16.mxu0 (!%p2772_p6), %v4268_v53  ;;  %1751 = vmatprep.mubr.bf16.mxu0 (!%p2772_p6), %v3582_v55  ;;  %v4284_v58 = vld [vmem:[#allocation2 + $0x18] sm:$0xff] (!%p2772_p6)  ;;  %v4286_v59 = vld [vmem:[#allocation2 + $0x60] sm:$0xff] (!%p2772_p6)  ;;  %v4292_v61 = vld [vmem:[#allocation2 + $0x68] sm:$0xff] (!%p2772_p6) }
 0x32a   : > { %v4290_v60 = vld [vmem:[#allocation2 + $0x20] sm:$0xff] (!%p2772_p6)  ;;  %v4296_v62 = vld [vmem:[#allocation2 + $0x28] sm:$0xff] (!%p2772_p6)  ;;  %v4302_v0 = vld [vmem:[#allocation2 + $0x30] sm:$0xff] (!%p2772_p6) }
 0x32b   : > { %v4304_v2 = vld [vmem:[#allocation2 + $0x78] sm:$0xff] (!%p2772_p6)  ;;  %v3580_v4 = vld [vmem:[#allocation4] ss:$8 sps:$4 sm:$0xff] (!%p2772_p6)   ;;  %v3628_v5 = vld [vmem:[#allocation11 + $0x40] sm:$0xff] (!%p2772_p6)  }
 0x32c   : > { %3073 = vmatpush3.bf16.msra.mxu0 (!%p2772_p6), %v4272_v1  ;;  %v4307_v3 = vld [vmem:[#allocation2 + $0x38] sm:$0xff] (!%p2772_p6)  ;;  %v3629_v7 = vld [vmem:[#allocation11] sm:$0xff] (!%p2772_p6)   ;;  %3182 = vmatprep.subr.bf16.mxu1 (!%p2772_p6), %v3628_v5  ;;  %v3632_v10 = vld [vmem:[#allocation11 + $0x50] sm:$0xff] (!%p2772_p6)  }
 0x32d   : > { %3074 = vmatprep.subr.bf16.mxu0 (!%p2772_p6), %v4274_v54  ;;  %v3583_v6 = vld [vmem:[#allocation4 + $0x14] ss:$8 sps:$4 sm:$0xff] (!%p2772_p6)   ;;  %3183 = vmatpush3.bf16.msra.mxu1 (!%p2772_p6), %v3629_v7  ;;  %v3633_v11 = vld [vmem:[#allocation11 + $0x10] sm:$0xff] (!%p2772_p6)   ;;  %v3585_v12 = vld [vmem:[#allocation4 + $0x10] ss:$8 sps:$4 sm:$0xff] (!%p2772_p6)  }
 0x32e   : > { %v3630_v8 = vld [vmem:[#allocation11 + $0x48] sm:$0xff]   ;;  %v3634_v13 = vld [vmem:[#allocation11 + $0x58] sm:$0xff]   ;;  %v3636_v16 = vld [vmem:[#allocation11 + $0x60] sm:$0xff]  }
 0x32f   : > { %v3631_v9 = vld [vmem:[#allocation11 + $0x8] sm:$0xff]   ;;  %3184 = vmatprep.subr.bf16.mxu1 %v3630_v8  ;;  %v3586_v14 = vld [vmem:[#allocation4 + $0x24] ss:$8 sps:$4 sm:$0xff]   ;;  %v3637_v17 = vld [vmem:[#allocation11 + $0x20] sm:$0xff]  }
 0x330   : > { %3075 = vmatpush3.bf16.msra.mxu0 %v4278_v56  ;;  %v3635_v15 = vld [vmem:[#allocation11 + $0x18] sm:$0xff]   ;;  %v3638_v18 = vld [vmem:[#allocation11 + $0x68] sm:$0xff]   ;;  %v3640_v38 = vld [vmem:[#allocation11 + $0x70] sm:$0xff]  }
 0x331   : > { %3076 = vmatprep.subr.bf16.mxu0 %v4280_v57  ;;  %3185 = vmatpush3.bf16.msra.mxu1 %v3631_v9  ;;  %v3588_v19 = vld [vmem:[#allocation4 + $0x20] ss:$8 sps:$4 sm:$0xff]   ;;  %v3589_v20 = vld [vmem:[#allocation4 + $0x34] ss:$8 sps:$4 sm:$0xff]   ;;  %v3591_v22 = vld [vmem:[#allocation4 + $0x30] ss:$8 sps:$4 sm:$0xff]  }
 0x332   : > { %3186 = vmatprep.subr.bf16.mxu1 %v3632_v10  ;;  %v3639_v21 = vld [vmem:[#allocation11 + $0x28] sm:$0xff]   ;;  %v3592_v23 = vld [vmem:[#allocation4 + $0x44] ss:$8 sps:$4 sm:$0xff]   ;;  %v3594_v24 = vld [vmem:[#allocation4 + $0x40] ss:$8 sps:$4 sm:$0xff]  }
 0x333   : > { %v3595_v25 = vld [vmem:[#allocation4 + $0x54] ss:$8 sps:$4 sm:$0xff]   ;;  %v3597_v26 = vld [vmem:[#allocation4 + $0x50] ss:$8 sps:$4 sm:$0xff]   ;;  %v3598_v27 = vld [vmem:[#allocation4 + $0x64] ss:$8 sps:$4 sm:$0xff]  }
 0x334   : > { %3077 = vmatpush3.bf16.msra.mxu0 %v4284_v58  ;;  %v3600_v28 = vld [vmem:[#allocation4 + $0x60] ss:$8 sps:$4 sm:$0xff]   ;;  %v3601_v29 = vld [vmem:[#allocation4 + $0x74] ss:$8 sps:$4 sm:$0xff]   ;;  %v3603_v30 = vld [vmem:[#allocation4 + $0x70] ss:$8 sps:$4 sm:$0xff]  }
 0x335   : > { %3078 = vmatprep.subr.bf16.mxu0 %v4286_v59  ;;  %3187 = vmatpush3.bf16.msra.mxu1 %v3633_v11  ;;  %v3604_v31 = vld [vmem:[#allocation4 + $0x84] ss:$8 sps:$4 sm:$0xff]   ;;  %v3606_v32 = vld [vmem:[#allocation4 + $0x80] ss:$8 sps:$4 sm:$0xff]   ;;  %v3607_v33 = vld [vmem:[#allocation4 + $0x94] ss:$8 sps:$4 sm:$0xff]  }
 0x336   : > { %3188 = vmatprep.subr.bf16.mxu1 %v3634_v13  ;;  %v3609_v34 = vld [vmem:[#allocation4 + $0x90] ss:$8 sps:$4 sm:$0xff]   ;;  %v3610_v35 = vld [vmem:[#allocation4 + $0xa4] ss:$8 sps:$4 sm:$0xff]   ;;  %v3612_v36 = vld [vmem:[#allocation4 + $0xa0] ss:$8 sps:$4 sm:$0xff]  }
 0x337   : > { %v3613_v37 = vld [vmem:[#allocation4 + $0xb4] ss:$8 sps:$4 sm:$0xff]   ;;  %v3641_v39 = vld [vmem:[#allocation11 + $0x30] sm:$0xff]   ;;  %v3615_v40 = vld [vmem:[#allocation4 + $0xb0] ss:$8 sps:$4 sm:$0xff]  }
 0x338   : > { %3079 = vmatpush3.bf16.msra.mxu0 %v4290_v60  ;;  %v3616_v41 = vld [vmem:[#allocation4 + $0xc4] ss:$8 sps:$4 sm:$0xff]   ;;  %v3618_v44 = vld [vmem:[#allocation4 + $0xc0] ss:$8 sps:$4 sm:$0xff]   ;;  %v3619_v45 = vld [vmem:[#allocation4 + $0xd4] ss:$8 sps:$4 sm:$0xff]  }
 0x339   : > { %3080 = vmatprep.subr.bf16.mxu0 %v4292_v61  ;;  %3189 = vmatpush3.bf16.msra.mxu1 %v3635_v15  ;;  %v3642_v42 = vld [vmem:[#allocation11 + $0x78] sm:$0xff]   ;;  %v3621_v46 = vld [vmem:[#allocation4 + $0xd0] ss:$8 sps:$4 sm:$0xff]   ;;  %v3625_v49 = vld [vmem:[#allocation4 + $0xf4] ss:$8 sps:$4 sm:$0xff]  }
 0x33a   : > { %3190 = vmatprep.subr.bf16.mxu1 %v3636_v16  ;;  %v3643_v43 = vld [vmem:[#allocation11 + $0x38] sm:$0xff]   ;;  %v3627_v50 = vld [vmem:[#allocation4 + $0xf0] ss:$8 sps:$4 sm:$0xff]  }
 0x33b   : > { %v3622_v47 = vld [vmem:[#allocation4 + $0xe4] ss:$8 sps:$4 sm:$0xff]   ;;  %v3624_v48 = vld [vmem:[#allocation4 + $0xe0] ss:$8 sps:$4 sm:$0xff]  }
 0x33c   : > { %3081 = vmatpush3.bf16.msra.mxu0 %v4296_v62 }
 0x33d   : > { %3082 = vmatprep.subr.bf16.mxu0 %v4298_v63  ;;  %3191 = vmatpush3.bf16.msra.mxu1 %v3637_v17 }
 0x33e   : > { %3192 = vmatprep.subr.bf16.mxu1 %v3638_v18 }
 0x340   : > { %3083 = vmatpush3.bf16.msra.mxu0 %v4302_v0 }
 0x341   : > { %3084 = vmatprep.subr.bf16.mxu0 %v4304_v2  ;;  %3193 = vmatpush3.bf16.msra.mxu1 %v3639_v21 }
 0x342   : > { %3194 = vmatprep.subr.bf16.mxu1 %v3640_v38 }
 0x344   : > { %3085 = vmatpush3.bf16.msra.mxu0 %v4307_v3 }
 0x345   : > { %3195 = vmatpush3.bf16.msra.mxu1 %v3641_v39 }
 0x346   : > { %3196 = vmatprep.subr.bf16.mxu1 %v3642_v42 }
 0x347   : > { %1752 = vmatmul.mubr.bf16.vlgmr.msra.gmra.mrb[0].mxu0 %v3580_v4 }
 0x348   : > { %1759 = vmatprep.mubr.bf16.mxu0 %v3583_v6 }
 0x349   : > { %3197 = vmatpush3.bf16.msra.mxu1 %v3643_v43 }
 0x34f   : > { %1760 = vmatmul.mubr.bf16.gmra.mrb[4].mxu0 %v3585_v12 }
 0x350   : > { %1767 = vmatprep.mubr.bf16.mxu0 %v3586_v14 }
 0x357   : > { %1768 = vmatmul.mubr.bf16.gmra.mrb[8].mxu0 %v3588_v19 }
 0x358   : > { %1775 = vmatprep.mubr.bf16.mxu0 %v3589_v20 }
 0x35f   : > { %1776 = vmatmul.mubr.bf16.gmra.mrb[12].mxu0 %v3591_v22 }
 0x360   : > { %1783 = vmatprep.mubr.bf16.mxu0 %v3592_v23 }
 0x367   : > { %1784 = vmatmul.mubr.bf16.gmra.mrb[16].mxu0 %v3594_v24 }
 0x368   : > { %1791 = vmatprep.mubr.bf16.mxu0 %v3595_v25 }
 0x36f   : > { %1792 = vmatmul.mubr.bf16.gmra.mrb[20].mxu0 %v3597_v26 }
 0x370   : > { %1799 = vmatprep.mubr.bf16.mxu0 %v3598_v27 }
 0x377   : > { %1800 = vmatmul.mubr.bf16.gmra.mrb[24].mxu0 %v3600_v28 }
 0x378   : > { %1807 = vmatprep.mubr.bf16.mxu0 %v3601_v29 }
 0x37f   : > { %1808 = vmatmul.mubr.bf16.gmra.mrb[28].mxu0 %v3603_v30 }
 0x380   : > { %1815 = vmatprep.mubr.bf16.mxu0 %v3604_v31 }
 0x387   : > { %1816 = vmatmul.mubr.bf16.gmra.mrb[32].mxu0 %v3606_v32 }
 0x388   : > { %1823 = vmatprep.mubr.bf16.mxu0 %v3607_v33 }
 0x38f   : > { %1824 = vmatmul.mubr.bf16.gmra.mrb[36].mxu0 %v3609_v34 }
 0x390   : > { %1831 = vmatprep.mubr.bf16.mxu0 %v3610_v35 }
 0x397   : > { %1832 = vmatmul.mubr.bf16.gmra.mrb[40].mxu0 %v3612_v36 }
 0x398   : > { %1839 = vmatprep.mubr.bf16.mxu0 %v3613_v37 }
 0x39f   : > { %1840 = vmatmul.mubr.bf16.gmra.mrb[44].mxu0 %v3615_v40 }
 0x3a0   : > { %1847 = vmatprep.mubr.bf16.mxu0 %v3616_v41 }
 0x3a7   : > { %1848 = vmatmul.mubr.bf16.gmra.mrb[48].mxu0 %v3618_v44 }
 0x3a8   : > { %1855 = vmatprep.mubr.bf16.mxu0 %v3619_v45 }
 0x3af   : > { %1856 = vmatmul.mubr.bf16.gmra.mrb[52].mxu0 %v3621_v46 }
 0x3b0   : > { %1863 = vmatprep.mubr.bf16.mxu0 %v3622_v47 }
 0x3b7   : > { %1864 = vmatmul.mubr.bf16.gmra.mrb[56].mxu0 %v3624_v48 }
 0x3b8   : > { %1871 = vmatprep.mubr.bf16.mxu0 %v3625_v49 }
 0x3bf   : > { %1872 = vmatmul.mubr.bf16.gmra.mrb[60].mxu0 %v3627_v50 }
 0x41a   : > { %v3086_v52 = vpop.f32.mrb[0].mxu0 }
 0x41b   : > { %v3087_v55 = vpop.f32.mrb[1].mxu0 }
 0x41c   : > { %v3088_v4 = vadd.f32 %v3087_v55, %v3086_v52  ;;  %v3089_v5 = vpop.f32.mrb[2].mxu0 }
 0x41d   : > { %v3090_v6 = vpop.f32.mrb[3].mxu0 }
 0x41e   : > { %v3091_v7 = vadd.f32 %v3090_v6, %v3089_v5 }
 0x420   : > { %v1900_v8 = vpack.c.bf16 %v3091_v7, %v3088_v4 }
 0x422   : > { %v3092_v9 = vpop.f32.mrb[4].mxu0  ;;  %2084 = vmatmul.mubr.bf16.vlgmr.msra.gmra.mrb[0].mxu1 %v1900_v8 }
 0x423   : > { %v3093_v10 = vpop.f32.mrb[5].mxu0  ;;  %2091 = vmatprep.mubr.bf16.mxu1 %v4272_v1 }
 0x424   : > { %v3094_v11 = vadd.f32 %v3093_v10, %v3092_v9  ;;  %v3095_v12 = vpop.f32.mrb[6].mxu0 }
 0x425   : > { %v3096_v13 = vpop.f32.mrb[7].mxu0 }
 0x426   : > { %v3097_v14 = vadd.f32 %v3096_v13, %v3095_v12 }
 0x428   : > { %v1901_v15 = vpack.c.bf16 %v3097_v14, %v3094_v11 }
 0x42a   : > { %v3098_v16 = vpop.f32.mrb[8].mxu0  ;;  %2092 = vmatmul.mubr.bf16.gmra.mrb[4].mxu1 %v1901_v15 }
 0x42b   : > { %v3099_v17 = vpop.f32.mrb[9].mxu0  ;;  %2099 = vmatprep.mubr.bf16.mxu1 %v4278_v56 }
 0x42c   : > { %v3100_v18 = vadd.f32 %v3099_v17, %v3098_v16  ;;  %v3101_v19 = vpop.f32.mrb[10].mxu0 }
 0x42d   : > { %v3102_v20 = vpop.f32.mrb[11].mxu0 }
 0x42e   : > { %v3103_v21 = vadd.f32 %v3102_v20, %v3101_v19 }
 0x430   : > { %v1902_v22 = vpack.c.bf16 %v3103_v21, %v3100_v18 }
 0x432   : > { %v3104_v23 = vpop.f32.mrb[12].mxu0  ;;  %2100 = vmatmul.mubr.bf16.gmra.mrb[8].mxu1 %v1902_v22 }
 0x433   : > { %v3105_v24 = vpop.f32.mrb[13].mxu0  ;;  %2107 = vmatprep.mubr.bf16.mxu1 %v4284_v58 }
 0x434   : > { %v3106_v1 = vadd.f32 %v3105_v24, %v3104_v23  ;;  %v3107_v25 = vpop.f32.mrb[14].mxu0 }
 0x435   : > { %v3108_v26 = vpop.f32.mrb[15].mxu0 }
 0x436   : > { %v3109_v27 = vadd.f32 %v3108_v26, %v3107_v25 }
 0x438   : > { %v1903_v28 = vpack.c.bf16 %v3109_v27, %v3106_v1 }
 0x43a   : > { %v3110_v29 = vpop.f32.mrb[16].mxu0  ;;  %2108 = vmatmul.mubr.bf16.gmra.mrb[12].mxu1 %v1903_v28 }
 0x43b   : > { %v3111_v30 = vpop.f32.mrb[17].mxu0  ;;  %2115 = vmatprep.mubr.bf16.mxu1 %v4290_v60 }
 0x43c   : > { %v3112_v56 = vadd.f32 %v3111_v30, %v3110_v29  ;;  %v3113_v31 = vpop.f32.mrb[18].mxu0 }
 0x43d   : > { %v3114_v32 = vpop.f32.mrb[19].mxu0 }
 0x43e   : > { %v3115_v33 = vadd.f32 %v3114_v32, %v3113_v31 }
 0x440   : > { %v1904_v34 = vpack.c.bf16 %v3115_v33, %v3112_v56 }
 0x442   : > { %v3116_v35 = vpop.f32.mrb[20].mxu0  ;;  %2116 = vmatmul.mubr.bf16.gmra.mrb[16].mxu1 %v1904_v34 }
 0x443   : > { %v3117_v36 = vpop.f32.mrb[21].mxu0  ;;  %2123 = vmatprep.mubr.bf16.mxu1 %v4296_v62 }
 0x444   : > { %v3118_v58 = vadd.f32 %v3117_v36, %v3116_v35  ;;  %v3119_v37 = vpop.f32.mrb[22].mxu0 }
 0x445   : > { %v3120_v38 = vpop.f32.mrb[23].mxu0 }
 0x446   : > { %v3121_v39 = vadd.f32 %v3120_v38, %v3119_v37 }
 0x448   : > { %v1905_v40 = vpack.c.bf16 %v3121_v39, %v3118_v58 }
 0x44a   : > { %v3122_v41 = vpop.f32.mrb[24].mxu0  ;;  %2124 = vmatmul.mubr.bf16.gmra.mrb[20].mxu1 %v1905_v40 }
 0x44b   : > { %v3123_v42 = vpop.f32.mrb[25].mxu0  ;;  %2131 = vmatprep.mubr.bf16.mxu1 %v4302_v0 }
 0x44c   : > { %v3124_v60 = vadd.f32 %v3123_v42, %v3122_v41  ;;  %v3125_v43 = vpop.f32.mrb[26].mxu0 }
 0x44d   : > { %v3126_v44 = vpop.f32.mrb[27].mxu0 }
 0x44e   : > { %v3127_v45 = vadd.f32 %v3126_v44, %v3125_v43 }
 0x450   : > { %v1906_v46 = vpack.c.bf16 %v3127_v45, %v3124_v60 }
 0x452   : > { %v3128_v47 = vpop.f32.mrb[28].mxu0  ;;  %2132 = vmatmul.mubr.bf16.gmra.mrb[24].mxu1 %v1906_v46 }
 0x453   : > { %v3129_v48 = vpop.f32.mrb[29].mxu0  ;;  %2139 = vmatprep.mubr.bf16.mxu1 %v4307_v3 }
 0x454   : > { %v3130_v62 = vadd.f32 %v3129_v48, %v3128_v47  ;;  %v3131_v49 = vpop.f32.mrb[30].mxu0 }
 0x455   : > { %v3132_v50 = vpop.f32.mrb[31].mxu0 }
 0x456   : > { %v3133_v52 = vadd.f32 %v3132_v50, %v3131_v49 }
 0x458   : > { %v1907_v55 = vpack.c.bf16 %v3133_v52, %v3130_v62 }
 0x45a   : > { %v3134_v4 = vpop.f32.mrb[32].mxu0  ;;  %2140 = vmatmul.mubr.bf16.gmra.mrb[28].mxu1 %v1907_v55 }
 0x45b   : > { %v3135_v5 = vpop.f32.mrb[33].mxu0  ;;  %2147 = vmatprep.mubr.bf16.mxu1 %v4266_v51 }
 0x45c   : > { %v3136_v0 = vadd.f32 %v3135_v5, %v3134_v4  ;;  %v3137_v6 = vpop.f32.mrb[34].mxu0 }
 0x45d   : > { %v3138_v7 = vpop.f32.mrb[35].mxu0 }
 0x45e   : > { %v3139_v8 = vadd.f32 %v3138_v7, %v3137_v6 }
 0x460   : > { %v1908_v9 = vpack.c.bf16 %v3139_v8, %v3136_v0 }
 0x462   : > { %v3140_v10 = vpop.f32.mrb[36].mxu0  ;;  %2148 = vmatmul.mubr.bf16.gmra.mrb[32].mxu1 %v1908_v9  ;;  %v3646_v9 = vld [vmem:[#allocation13] sm:$0xff]  }
 0x463   : > { %v3141_v11 = vpop.f32.mrb[37].mxu0  ;;  %2155 = vmatprep.mubr.bf16.mxu1 %v4268_v53 }
 0x464   : > { %v3142_v3 = vadd.f32 %v3141_v11, %v3140_v10  ;;  %v3143_v12 = vpop.f32.mrb[38].mxu0  ;;  %v3947_v11 = vmov 0.0  }
 0x465   : > { %v3144_v13 = vpop.f32.mrb[39].mxu0  ;;  %3334 = vmatprep.subr.bf16.mxu1 %v3947_v11 }
 0x466   : > { %v3145_v14 = vadd.f32 %v3144_v13, %v3143_v12  ;;  %3335 = vmatpush3.bf16.msra.mxu1 %v3646_v9 }
 0x467   : > { %3336 = vmatprep.subr.bf16.mxu1 %v3947_v11 }
 0x468   : > { %v1909_v15 = vpack.c.bf16 %v3145_v14, %v3142_v3  ;;  %v3647_v14 = vld [vmem:[#allocation13 + $0x8] sm:$0xff]  }
 0x46a   : > { %v3146_v16 = vpop.f32.mrb[40].mxu0  ;;  %2156 = vmatmul.mubr.bf16.gmra.mrb[36].mxu1 %v1909_v15 }
 0x46b   : > { %v3147_v17 = vpop.f32.mrb[41].mxu0  ;;  %2163 = vmatprep.mubr.bf16.mxu1 %v4274_v54  ;;  %3337 = vmatpush3.bf16.msra.mxu1 %v3647_v14 }
 0x46c   : > { %v3148_v51 = vadd.f32 %v3147_v17, %v3146_v16  ;;  %v3149_v18 = vpop.f32.mrb[42].mxu0  ;;  %3338 = vmatprep.subr.bf16.mxu1 %v3947_v11 }
 0x46d   : > { %v3150_v19 = vpop.f32.mrb[43].mxu0 }
 0x46e   : > { %v3151_v20 = vadd.f32 %v3150_v19, %v3149_v18  ;;  %v3648_v18 = vld [vmem:[#allocation13 + $0x10] sm:$0xff]  }
 0x46f   : > { %3339 = vmatpush3.bf16.msra.mxu1 %v3648_v18 }
 0x470   : > { %v1910_v21 = vpack.c.bf16 %v3151_v20, %v3148_v51  ;;  %3340 = vmatprep.subr.bf16.mxu1 %v3947_v11 }
 0x472   : > { %v3152_v22 = vpop.f32.mrb[44].mxu0  ;;  %2164 = vmatmul.mubr.bf16.gmra.mrb[40].mxu1 %v1910_v21 }
 0x473   : > { %v3153_v23 = vpop.f32.mrb[45].mxu0  ;;  %2171 = vmatprep.mubr.bf16.mxu1 %v4280_v57 }
 0x474   : > { %v3154_v53 = vadd.f32 %v3153_v23, %v3152_v22  ;;  %v3155_v24 = vpop.f32.mrb[46].mxu0 }
 0x475   : > { %v3156_v1 = vpop.f32.mrb[47].mxu0 }
 0x476   : > { %v3157_v25 = vadd.f32 %v3156_v1, %v3155_v24  ;;  %v3649_v1 = vld [vmem:[#allocation13 + $0x18] sm:$0xff]  }
 0x477   : > { %3341 = vmatpush3.bf16.msra.mxu1 %v3649_v1 }
 0x478   : > { %v1911_v26 = vpack.c.bf16 %v3157_v25, %v3154_v53  ;;  %3342 = vmatprep.subr.bf16.mxu1 %v3947_v11 }
 0x47a   : > { %v3158_v27 = vpop.f32.mrb[48].mxu0  ;;  %2172 = vmatmul.mubr.bf16.gmra.mrb[44].mxu1 %v1911_v26 }
 0x47b   : > { %v3159_v28 = vpop.f32.mrb[49].mxu0  ;;  %2179 = vmatprep.mubr.bf16.mxu1 %v4286_v59 }
 0x47c   : > { %v3160_v54 = vadd.f32 %v3159_v28, %v3158_v27  ;;  %v3161_v29 = vpop.f32.mrb[50].mxu0 }
 0x47d   : > { %v3162_v30 = vpop.f32.mrb[51].mxu0 }
 0x47e   : > { %v3163_v56 = vadd.f32 %v3162_v30, %v3161_v29 }
 0x480   : > { %v1912_v31 = vpack.c.bf16 %v3163_v56, %v3160_v54  ;;  %v3650_v54 = vld [vmem:[#allocation13 + $0x20] sm:$0xff]  }
 0x481   : > { %3343 = vmatpush3.bf16.msra.mxu1 %v3650_v54 }
 0x482   : > { %v3164_v32 = vpop.f32.mrb[52].mxu0  ;;  %2180 = vmatmul.mubr.bf16.gmra.mrb[48].mxu1 %v1912_v31  ;;  %3344 = vmatprep.subr.bf16.mxu1 %v3947_v11 }
 0x483   : > { %v3165_v33 = vpop.f32.mrb[53].mxu0  ;;  %2187 = vmatprep.mubr.bf16.mxu1 %v4292_v61 }
 0x484   : > { %v3166_v57 = vadd.f32 %v3165_v33, %v3164_v32  ;;  %v3167_v34 = vpop.f32.mrb[54].mxu0 }
 0x485   : > { %v3168_v35 = vpop.f32.mrb[55].mxu0 }
 0x486   : > { %v3169_v36 = vadd.f32 %v3168_v35, %v3167_v34  ;;  %v3651_v34 = vld [vmem:[#allocation13 + $0x28] sm:$0xff]  }
 0x487   : > { %3345 = vmatpush3.bf16.msra.mxu1 %v3651_v34 }
 0x488   : > { %v1913_v58 = vpack.c.bf16 %v3169_v36, %v3166_v57  ;;  %3346 = vmatprep.subr.bf16.mxu1 %v3947_v11 }
 0x48a   : > { %v3170_v37 = vpop.f32.mrb[56].mxu0  ;;  %2188 = vmatmul.mubr.bf16.gmra.mrb[52].mxu1 %v1913_v58 }
 0x48b   : > { %v3171_v38 = vpop.f32.mrb[57].mxu0  ;;  %2195 = vmatprep.mubr.bf16.mxu1 %v4298_v63  ;;  %v4329_v63 = vld [vmem:[%s4455_s6] ss:$0 sm:$0xff] }
 0x48c   : > { %v3172_v59 = vadd.f32 %v3171_v38, %v3170_v37  ;;  %v3173_v39 = vpop.f32.mrb[58].mxu0  ;;  %v3652_v38 = vld [vmem:[#allocation13 + $0x30] sm:$0xff]  }
 0x48d   : > { %v3174_v40 = vpop.f32.mrb[59].mxu0  ;;  %3347 = vmatpush3.bf16.msra.mxu1 %v3652_v38 }
 0x48e   : > { %v3175_v41 = vadd.f32 %v3174_v40, %v3173_v39  ;;  %3348 = vmatprep.subr.bf16.mxu1 %v3947_v11 }
 0x490   : > { %v1914_v42 = vpack.c.bf16 %v3175_v41, %v3172_v59 }
 0x492   : > { %v3176_v60 = vpop.f32.mrb[60].mxu0  ;;  %2196 = vmatmul.mubr.bf16.gmra.mrb[56].mxu1 %v1914_v42 }
 0x493   : > { %v3177_v43 = vpop.f32.mrb[61].mxu0  ;;  %2203 = vmatprep.mubr.bf16.mxu1 %v4304_v2  ;;  %v4332_v2 = vld [vmem:[#allocation9] sm:$0xff] }
 0x494   : > { %v3178_v61 = vadd.f32 %v3177_v43, %v3176_v60  ;;  %v3179_v44 = vpop.f32.mrb[62].mxu0  ;;  %v2823_v5 = vcombine.high %v4332_v2, %v4332_v2 }
 0x495   : > { %v3180_v45 = vpop.f32.mrb[63].mxu0 }
 0x496   : > { %v3181_v46 = vadd.f32 %v3180_v45, %v3179_v44  ;;  %2301 = vmatprep.mubr.bf16.mxu0 %v2823_v5 }
 0x498   : > { %v1915_v47 = vpack.c.bf16 %v3181_v46, %v3178_v61  ;;  %v3653_v61 = vld [vmem:[#allocation13 + $0x38] sm:$0xff]  }
 0x499   : > { %3349 = vmatpush3.bf16.msra.mxu1 %v3653_v61 }
 0x49a   : > { %2204 = vmatmul.mubr.bf16.gmra.mrb[60].mxu1 %v1915_v47 }
 0x49b   : > { %3350 = vmatprep.mubr.msk.bf16.mxu1 %vm3948_vm0, %v3947_v11 }
 0x4f5   : > { %v3198_v48 = vpop.f32.mrb[0].mxu1 }
 0x4f6   : > { %v3199_v62 = vpop.f32.mrb[1].mxu1 }
 0x4f7   : > { %v3200_v49 = vadd.f32 %v3199_v62, %v3198_v48  ;;  %v3201_v50 = vpop.f32.mrb[2].mxu1 }
 0x4f8   : > { %v3202_v52 = vpop.f32.mrb[3].mxu1 }
 0x4f9   : > { %v2086_v55 = vadd.f32 %v3200_v49, %v4329_v63  ;;  %v3203_v4 = vadd.f32 %v3202_v52, %v3201_v50 }
 0x4fb   : > { %v2089_v0 = vadd.f32 %v3203_v4, %v4329_v63  ;;  %v2212_v6 = vmax.f32 %v2086_v55, 0.0 }
 0x4fd   : > { %v2213_v7 = vmax.f32 %v2089_v0, 0.0  ;;  %v3204_v8 = vpop.f32.mrb[4].mxu1 }
 0x4fe   : > { %v3205_v10 = vpop.f32.mrb[5].mxu1 }
 0x4ff   : > { %v4338_v3 = vpack.c.bf16 %v2213_v7, %v2212_v6  ;;  %v3206_v12 = vadd.f32 %v3205_v10, %v3204_v8  ;;  %v3207_v13 = vpop.f32.mrb[6].mxu1 }
 0x500   : > { %v3208_v15 = vpop.f32.mrb[7].mxu1 }
 0x501   : > { %v2094_v16 = vadd.f32 %v3206_v12, %v4329_v63  ;;  %v3209_v17 = vadd.f32 %v3208_v15, %v3207_v13 }
 0x503   : > { %v2097_v51 = vadd.f32 %v3209_v17, %v4329_v63  ;;  %v2214_v19 = vmax.f32 %v2094_v16, 0.0 }
 0x505   : > { %v2215_v20 = vmax.f32 %v2097_v51, 0.0  ;;  %v3210_v21 = vpop.f32.mrb[8].mxu1 }
 0x506   : > { %v3211_v22 = vpop.f32.mrb[9].mxu1 }
 0x507   : > { %v4344_v23 = vpack.c.bf16 %v2215_v20, %v2214_v19  ;;  %v3212_v53 = vadd.f32 %v3211_v22, %v3210_v21  ;;  %v3213_v24 = vpop.f32.mrb[10].mxu1 }
 0x508   : > { %v3214_v25 = vpop.f32.mrb[11].mxu1 }
 0x509   : > { %v2102_v26 = vadd.f32 %v3212_v53, %v4329_v63  ;;  %v3215_v27 = vadd.f32 %v3214_v25, %v3213_v24 }
 0x50b   : > { %v2105_v28 = vadd.f32 %v3215_v27, %v4329_v63  ;;  %v2216_v29 = vmax.f32 %v2102_v26, 0.0 }
 0x50d   : > { %v2217_v30 = vmax.f32 %v2105_v28, 0.0  ;;  %v3216_v56 = vpop.f32.mrb[12].mxu1 }
 0x50e   : > { %v3217_v31 = vpop.f32.mrb[13].mxu1 }
 0x50f   : > { %v4350_v32 = vpack.c.bf16 %v2217_v30, %v2216_v29  ;;  %v3218_v33 = vadd.f32 %v3217_v31, %v3216_v56  ;;  %v3219_v57 = vpop.f32.mrb[14].mxu1 }
 0x510   : > { %v3220_v35 = vpop.f32.mrb[15].mxu1 }
 0x511   : > { %v2110_v36 = vadd.f32 %v3218_v33, %v4329_v63  ;;  %v3221_v58 = vadd.f32 %v3220_v35, %v3219_v57 }
 0x513   : > { %v2113_v37 = vadd.f32 %v3221_v58, %v4329_v63  ;;  %v2218_v59 = vmax.f32 %v2110_v36, 0.0 }
 0x515   : > { %v2219_v39 = vmax.f32 %v2113_v37, 0.0  ;;  %v3222_v40 = vpop.f32.mrb[16].mxu1 }
 0x516   : > { %v3223_v41 = vpop.f32.mrb[17].mxu1 }
 0x517   : > { %v4356_v42 = vpack.c.bf16 %v2219_v39, %v2218_v59  ;;  %v3224_v60 = vadd.f32 %v3223_v41, %v3222_v40  ;;  %v3225_v43 = vpop.f32.mrb[18].mxu1 }
 0x518   : > { %v3226_v44 = vpop.f32.mrb[19].mxu1 }
 0x519   : > { %v2118_v45 = vadd.f32 %v3224_v60, %v4329_v63  ;;  %v3227_v46 = vadd.f32 %v3226_v44, %v3225_v43 }
 0x51b   : > { %v2121_v47 = vadd.f32 %v3227_v46, %v4329_v63  ;;  %v2220_v48 = vmax.f32 %v2118_v45, 0.0 }
 0x51d   : > { %v2221_v62 = vmax.f32 %v2121_v47, 0.0  ;;  %v3228_v49 = vpop.f32.mrb[20].mxu1 }
 0x51e   : > { %v3229_v50 = vpop.f32.mrb[21].mxu1 }
 0x51f   : > { %v4361_v52 = vpack.c.bf16 %v2221_v62, %v2220_v48  ;;  %v3230_v55 = vadd.f32 %v3229_v50, %v3228_v49  ;;  %v3231_v4 = vpop.f32.mrb[22].mxu1 }
 0x520   : > { %v3232_v5 = vpop.f32.mrb[23].mxu1 }
 0x521   : > { %v2126_v0 = vadd.f32 %v3230_v55, %v4329_v63  ;;  %v3233_v6 = vadd.f32 %v3232_v5, %v3231_v4 }
 0x523   : > { %v2129_v7 = vadd.f32 %v3233_v6, %v4329_v63  ;;  %v2222_v8 = vmax.f32 %v2126_v0, 0.0 }
 0x525   : > { %v2223_v9 = vmax.f32 %v2129_v7, 0.0  ;;  %v3234_v10 = vpop.f32.mrb[24].mxu1 }
 0x526   : > { %v3235_v12 = vpop.f32.mrb[25].mxu1 }
 0x527   : > { %v4365_v13 = vpack.c.bf16 %v2223_v9, %v2222_v8  ;;  %v3236_v14 = vadd.f32 %v3235_v12, %v3234_v10  ;;  %v3237_v15 = vpop.f32.mrb[26].mxu1 }
 0x528   : > { %v3238_v16 = vpop.f32.mrb[27].mxu1 }
 0x529   : > { %v2134_v17 = vadd.f32 %v3236_v14, %v4329_v63  ;;  %v3239_v51 = vadd.f32 %v3238_v16, %v3237_v15 }
 0x52b   : > { %v2137_v18 = vadd.f32 %v3239_v51, %v4329_v63  ;;  %v2224_v19 = vmax.f32 %v2134_v17, 0.0 }
 0x52d   : > { %v2225_v20 = vmax.f32 %v2137_v18, 0.0  ;;  %v3240_v21 = vpop.f32.mrb[28].mxu1 }
 0x52e   : > { %v3241_v22 = vpop.f32.mrb[29].mxu1 }
 0x52f   : > { %v4369_v53 = vpack.c.bf16 %v2225_v20, %v2224_v19  ;;  %v3242_v24 = vadd.f32 %v3241_v22, %v3240_v21  ;;  %v3243_v1 = vpop.f32.mrb[30].mxu1 }
 0x530   : > { %v3244_v25 = vpop.f32.mrb[31].mxu1 }
 0x531   : > { %v2142_v26 = vadd.f32 %v3242_v24, %v4329_v63  ;;  %v3245_v27 = vadd.f32 %v3244_v25, %v3243_v1 }
 0x533   : > { %v2145_v28 = vadd.f32 %v3245_v27, %v4329_v63  ;;  %v2226_v54 = vmax.f32 %v2142_v26, 0.0 }
 0x535   : > { %v2227_v29 = vmax.f32 %v2145_v28, 0.0  ;;  %v3246_v30 = vpop.f32.mrb[32].mxu1 }
 0x536   : > { %v3247_v56 = vpop.f32.mrb[33].mxu1 }
 0x537   : > { %v4373_v31 = vpack.c.bf16 %v2227_v29, %v2226_v54  ;;  %v3248_v33 = vadd.f32 %v3247_v56, %v3246_v30  ;;  %v3249_v57 = vpop.f32.mrb[34].mxu1 }
 0x538   : > { %v3250_v34 = vpop.f32.mrb[35].mxu1 }
 0x539   : > { %v2150_v35 = vadd.f32 %v3248_v33, %v4329_v63  ;;  %v3251_v36 = vadd.f32 %v3250_v34, %v3249_v57 }
 0x53b   : > { %v2153_v58 = vadd.f32 %v3251_v36, %v4329_v63  ;;  %v2228_v37 = vmax.f32 %v2150_v35, 0.0 }
 0x53d   : > { %v2229_v38 = vmax.f32 %v2153_v58, 0.0  ;;  %v3252_v59 = vpop.f32.mrb[36].mxu1 }
 0x53e   : > { %v3253_v39 = vpop.f32.mrb[37].mxu1 }
 0x53f   : > { %v3254_v40 = vadd.f32 %v3253_v39, %v3252_v59  ;;  %v3255_v41 = vpop.f32.mrb[38].mxu1  ;;  %v2252_v60 = vpack.c.bf16 %v2229_v38, %v2228_v37 }
 0x540   : > { %v3256_v43 = vpop.f32.mrb[39].mxu1 }
 0x541   : > { %v2158_v61 = vadd.f32 %v3254_v40, %v4329_v63  ;;  %v3257_v44 = vadd.f32 %v3256_v43, %v3255_v41  ;;  %3294 = vmatprep.subr.bf16.mxu0 %v2252_v60 }
 0x542   : > { %3295 = vmatpush3.bf16.msra.mxu0 %v4338_v3 }
 0x543   : > { %v2161_v45 = vadd.f32 %v3257_v44, %v4329_v63  ;;  %v2230_v46 = vmax.f32 %v2158_v61, 0.0 }
 0x545   : > { %v2231_v47 = vmax.f32 %v2161_v45, 0.0  ;;  %v3258_v48 = vpop.f32.mrb[40].mxu1 }
 0x546   : > { %v3259_v62 = vpop.f32.mrb[41].mxu1 }
 0x547   : > { %v3260_v49 = vadd.f32 %v3259_v62, %v3258_v48  ;;  %v3261_v50 = vpop.f32.mrb[42].mxu1  ;;  %v2253_v55 = vpack.c.bf16 %v2231_v47, %v2230_v46 }
 0x548   : > { %v3262_v4 = vpop.f32.mrb[43].mxu1 }
 0x549   : > { %v2166_v5 = vadd.f32 %v3260_v49, %v4329_v63  ;;  %v3263_v0 = vadd.f32 %v3262_v4, %v3261_v50  ;;  %3296 = vmatprep.subr.bf16.mxu0 %v2253_v55 }
 0x54a   : > { %3297 = vmatpush3.bf16.msra.mxu0 %v4344_v23 }
 0x54b   : > { %v2169_v6 = vadd.f32 %v3263_v0, %v4329_v63  ;;  %v2232_v7 = vmax.f32 %v2166_v5, 0.0 }
 0x54d   : > { %v2233_v3 = vmax.f32 %v2169_v6, 0.0  ;;  %v3264_v8 = vpop.f32.mrb[44].mxu1  ;;  %v2822_v6 = vcombine.low %v4332_v2, %v4332_v2  ;;  %v3657_v2 = vld [vmem:[#allocation14 + $0x18] sm:$0xff]  }
 0x54e   : > { %v3265_v9 = vpop.f32.mrb[45].mxu1 }
 0x54f   : > { %v3266_v10 = vadd.f32 %v3265_v9, %v3264_v8  ;;  %v3267_v12 = vpop.f32.mrb[46].mxu1  ;;  %v2254_v14 = vpack.c.bf16 %v2233_v3, %v2232_v7  ;;  %v3656_v7 = vld [vmem:[#allocation14 + $0x10] sm:$0xff]   ;;  %v3659_v3 = vld [vmem:[#allocation14 + $0x28] sm:$0xff]  }
 0x550   : > { %v3268_v15 = vpop.f32.mrb[47].mxu1 }
 0x551   : > { %v2174_v16 = vadd.f32 %v3266_v10, %v4329_v63  ;;  %v3269_v17 = vadd.f32 %v3268_v15, %v3267_v12  ;;  %3298 = vmatprep.subr.bf16.mxu0 %v2254_v14 }
 0x552   : > { %3299 = vmatpush3.bf16.msra.mxu0 %v4350_v32 }
 0x553   : > { %v2177_v51 = vadd.f32 %v3269_v17, %v4329_v63  ;;  %v2234_v18 = vmax.f32 %v2174_v16, 0.0  ;;  %v3660_v16 = vld [vmem:[#allocation14 + $0x30] sm:$0xff]   ;;  %v3661_v17 = vld [vmem:[#allocation14 + $0x38] sm:$0xff]  }
 0x555   : > { %v2235_v23 = vmax.f32 %v2177_v51, 0.0  ;;  %v3270_v19 = vpop.f32.mrb[48].mxu1  ;;  %v2824_v51 = vld [vmem:[%s4457_s8] ss:$0 sm:$0xff] }
 0x556   : > { %v3271_v20 = vpop.f32.mrb[49].mxu1 }
 0x557   : > { %v3272_v21 = vadd.f32 %v3271_v20, %v3270_v19  ;;  %v3273_v22 = vpop.f32.mrb[50].mxu1  ;;  %v2255_v24 = vpack.c.bf16 %v2235_v23, %v2234_v18 }
 0x558   : > { %v3274_v1 = vpop.f32.mrb[51].mxu1 }
 0x559   : > { %v2182_v25 = vadd.f32 %v3272_v21, %v4329_v63  ;;  %v3275_v26 = vadd.f32 %v3274_v1, %v3273_v22  ;;  %3300 = vmatprep.subr.bf16.mxu0 %v2255_v24  ;;  %v2833_v1 = vld [vmem:[%s4489_s10] ss:$0 sm:$0xff] }
 0x55a   : > { %3301 = vmatpush3.bf16.msra.mxu0 %v4356_v42 }
 0x55b   : > { %v2185_v27 = vadd.f32 %v3275_v26, %v4329_v63  ;;  %v2236_v28 = vmax.f32 %v2182_v25, 0.0 }
 0x55d   : > { %v2237_v32 = vmax.f32 %v2185_v27, 0.0  ;;  %v3276_v54 = vpop.f32.mrb[52].mxu1 }
 0x55e   : > { %v3277_v29 = vpop.f32.mrb[53].mxu1 }
 0x55f   : > { %v3278_v30 = vadd.f32 %v3277_v29, %v3276_v54  ;;  %v3279_v56 = vpop.f32.mrb[54].mxu1  ;;  %v2256_v33 = vpack.c.bf16 %v2237_v32, %v2236_v28 }
 0x560   : > { %v3280_v57 = vpop.f32.mrb[55].mxu1 }
 0x561   : > { %v2190_v34 = vadd.f32 %v3278_v30, %v4329_v63  ;;  %v3281_v35 = vadd.f32 %v3280_v57, %v3279_v56  ;;  %3302 = vmatprep.subr.bf16.mxu0 %v2256_v33 }
 0x562   : > { %3303 = vmatpush3.bf16.msra.mxu0 %v4361_v52 }
 0x563   : > { %v2193_v36 = vadd.f32 %v3281_v35, %v4329_v63  ;;  %v2238_v58 = vmax.f32 %v2190_v34, 0.0 }
 0x565   : > { %v2239_v42 = vmax.f32 %v2193_v36, 0.0  ;;  %v3282_v37 = vpop.f32.mrb[56].mxu1 }
 0x566   : > { %v3283_v38 = vpop.f32.mrb[57].mxu1 }
 0x567   : > { %v3284_v59 = vadd.f32 %v3283_v38, %v3282_v37  ;;  %v3285_v39 = vpop.f32.mrb[58].mxu1  ;;  %v2257_v40 = vpack.c.bf16 %v2239_v42, %v2238_v58 }
 0x568   : > { %v3286_v41 = vpop.f32.mrb[59].mxu1 }
 0x569   : > { %v2198_v60 = vadd.f32 %v3284_v59, %v4329_v63  ;;  %v3287_v43 = vadd.f32 %v3286_v41, %v3285_v39  ;;  %3304 = vmatprep.subr.bf16.mxu0 %v2257_v40 }
 0x56a   : > { %3305 = vmatpush3.bf16.msra.mxu0 %v4365_v13 }
 0x56b   : > { %v2201_v61 = vadd.f32 %v3287_v43, %v4329_v63  ;;  %v2240_v44 = vmax.f32 %v2198_v60, 0.0 }
 0x56d   : > { %v2241_v52 = vmax.f32 %v2201_v61, 0.0  ;;  %v3288_v45 = vpop.f32.mrb[60].mxu1 }
 0x56e   : > { %v3289_v46 = vpop.f32.mrb[61].mxu1 }
 0x56f   : > { %v3290_v47 = vadd.f32 %v3289_v46, %v3288_v45  ;;  %v3291_v48 = vpop.f32.mrb[62].mxu1  ;;  %v2258_v62 = vpack.c.bf16 %v2241_v52, %v2240_v44 }
 0x570   : > { %v3292_v49 = vpop.f32.mrb[63].mxu1 }
 0x571   : > { %v2206_v50 = vadd.f32 %v3290_v47, %v4329_v63  ;;  %v3293_v55 = vadd.f32 %v3292_v49, %v3291_v48  ;;  %3306 = vmatprep.subr.bf16.mxu0 %v2258_v62 }
 0x572   : > { %3307 = vmatpush3.bf16.msra.mxu0 %v4369_v53  ;;  %v3654_v53 = vld [vmem:[#allocation14] sm:$0xff]  }
 0x573   : > { %v2209_v4 = vadd.f32 %v3293_v55, %v4329_v63  ;;  %v2242_v5 = vmax.f32 %v2206_v50, 0.0  ;;  %v3655_v63 = vld [vmem:[#allocation14 + $0x8] sm:$0xff]  }
 0x575   : > { %v2243_v13 = vmax.f32 %v2209_v4, 0.0 }
 0x577   : > { %v2259_v0 = vpack.c.bf16 %v2243_v13, %v2242_v5 }
 0x579   : > { %3308 = vmatprep.subr.bf16.mxu0 %v2259_v0 }
 0x57a   : > { %3309 = vmatpush3.bf16.msra.mxu0 %v4373_v31  ;;  %v3658_v31 = vld [vmem:[#allocation14 + $0x20] sm:$0xff]  }
 0x57b   : > { %3354 = vmatprep.subr.bf16.mxu0 %v3947_v11 }
 0x57d   : > { %2302 = vmatmul.mubr.bf16.vlgmr.msra.gmra.mrb[64].mxu0 %v2822_v6 }
 0x57e   : > { %3370 = vmatprep.mubr.msk.bf16.mxu0 %vm3948_vm0, %v3947_v11  ;;  %3355 = vmatpush3.bf16.msra.mxu0 %v3654_v53 }
 0x57f   : > { %3356 = vmatprep.subr.bf16.mxu0 %v3947_v11 }
 0x582   : > { %3357 = vmatpush3.bf16.msra.mxu0 %v3655_v63 }
 0x583   : > { %3358 = vmatprep.subr.bf16.mxu0 %v3947_v11 }
 0x586   : > { %3359 = vmatpush3.bf16.msra.mxu0 %v3656_v7 }
 0x587   : > { %3360 = vmatprep.subr.bf16.mxu0 %v3947_v11 }
 0x58a   : > { %3361 = vmatpush3.bf16.msra.mxu0 %v3657_v2 }
 0x58b   : > { %3362 = vmatprep.subr.bf16.mxu0 %v3947_v11 }
 0x58e   : > { %3363 = vmatpush3.bf16.msra.mxu0 %v3658_v31 }
 0x58f   : > { %3364 = vmatprep.subr.bf16.mxu0 %v3947_v11 }
 0x592   : > { %3365 = vmatpush3.bf16.msra.mxu0 %v3659_v3 }
 0x593   : > { %3366 = vmatprep.subr.bf16.mxu0 %v3947_v11 }
 0x596   : > { %3367 = vmatpush3.bf16.msra.mxu0 %v3660_v16 }
 0x597   : > { %3368 = vmatprep.subr.bf16.mxu0 %v3947_v11 }
 0x59a   : > { %3369 = vmatpush3.bf16.msra.mxu0 %v3661_v17 }
 0x650   : > { %v3310_v8 = vpop.f32.mrb[64].mxu0 }
 0x651   : > { %v3311_v9 = vpop.f32.mrb[65].mxu0 }
 0x652   : > { %v3312_v10 = vadd.f32 %v3311_v9, %v3310_v8  ;;  %v3313_v12 = vpop.f32.mrb[66].mxu0 }
 0x653   : > { %v3314_v14 = vpop.f32.mrb[67].mxu0 }
 0x654   : > { %v2315_v15 = vpack.c.bf16 %v3312_v10, %v3312_v10 }
 0x656   : > { %3351 = vmatmul.mubr.bf16.vlgmr.msra.gmra.mrb[64].mxu1 %v2315_v15 }
 0x729   : > { %v2421_v18 = vpop.f32.mrb[64].mxu1 }
 0x72a   : > { %v2422_v23 = vadd.f32 %v2824_v51, %v2421_v18  ;;  %v3352_v19 = vpop.f32.mrb[65].mxu1 }
 0x72b   : > { %v2424_v20 = vpop.f32.mrb[66].mxu1 }
 0x72c   : > { %v2427_v21 = vmax.f32 %v2422_v23, 0.0  ;;  %v3353_v22 = vpop.f32.mrb[67].mxu1 }
 0x72e   : > { %v2428_v24 = vpack.c.bf16 %v2427_v21, %v2427_v21 }
 0x730   : > { %3371 = vmatmul.mubr.bf16.vlgmr.msra.gmra.mrb[68].mxu0 %v2428_v24 }
 0x803   : > { %v2534_v25 = vpop.f32.mrb[68].mxu0 }
 0x804   : > { %v2535_v11 = vadd.f32 %v2833_v1, %v2534_v25  ;;  %v3372_v26 = vpop.f32.mrb[69].mxu0 }
 0x805   : > { %v2537_v27 = vpop.f32.mrb[70].mxu0 }
 0x806   : > { %2540 = vst [vmem:[#allocation16] sm:$0xff] %v2535_v11  ;;  %v3373_v28 = vpop.f32.mrb[71].mxu0 }
 0x807 PF: > { %p3444_p9 = scmp.eq.s32.totalorder %s4026_s20, 1  ;;  %s3949_s18 = smov [#allocation16]  }
 0x808   : > { %s2548_s26 = sshll.u32 %s3949_s18, 4  ;;  %s2549_s26 = int_to_ptr.vmem [resolvable:$true] %s2548_s26 }
 0x809   : > { %s3858_s28 = scalar_lea.vmem %s2549_s26, 128  ;;  %p3865_p4 = scmp.lt.s32.totalorder %s2549_s26, %s2549_s26 }
 0x80a   : > { %p3859_p7 = scmp.ne.s32.totalorder %s2549_s26, %s3858_s28  ;;  %p3866_p12 = scmp.lt.s32.totalorder %s3858_s28, %s3858_s28 }
 0x80c   : > { %p3860_p10 = pnand %p3859_p7, %p3444_p9  ;;  %p3867_p13 = por %p3866_p12, %p3865_p4 }
 0x80e   : > { %p3861_p11 = pneg %p3860_p10 }
 0x810   : > { %p3868_p0 = pnand %p3867_p13, %p3861_p11 }
 0x812   : > { %3871 = shalt.err (!%p3868_p0)
}
 0x813   : > { %s4490_s11 = sld [smem:[#allocation28_spill]] }
 0x819   : > { %s3872_s12 = scalar_lea.hbm %s4490_s11, 128 }
 0x81a   : > { %p3873_p1 = scmp.ne.s32.totalorder %s4490_s11, %s3872_s12  ;;  %p3878_p3 = scmp.lt.u32.totalorder %s3872_s12, %s4490_s11 }
 0x81c   : > { %p3874_p2 = pnand %p3873_p1, %p3444_p9 }
 0x81e   : > { %p3875_p5 = pneg %p3874_p2 }
 0x820   : > { %p3880_p8 = pnand %p3878_p3, %p3875_p5 }
 0x822   : > { %3883 = shalt.err (!%p3880_p8)
}
 0x823   : > { %3403 = dma.vmem_to_hbm [thread:$0]  (%p3444_p9), %s2549_s26, 128, %s4490_s11, [#allocation6]  }
 0x824   : > { %3921 = dma.done.wait (%p3444_p9), [#allocation6], 128  }
 0x825   : > { %3923 = vsyncadd (%p3444_p9), [#allocation6], 4294967168 }
 0x826 PF: > { %s26_s19 = sadd.s32 1, %s3934_s19   ;;  %s4491_s17 = sld [smem:[#allocation24_spill]] }
 0x827   : > { %p23_p6 = scmp.ge.s32.totalorder %s26_s19, 4   ;;  %s4492_s18 = sld [smem:[#allocation25_spill]] }
 0x829   :  { %25 = sbr.rel (!%p23_p6) target bundleno = 10 (0xa), region = 144 }
 0x830   :  { %2561 = vsyncpa [#allocation5], 1 }
 0x831   :  { %2563 = vsyncpa [#allocation5 + $0x1], 1 }
 0x832   :  { %2564 = vsyncpa [#allocation8], 1 }
 0x833   :  { %2565 = vsyncpa [#allocation12], 1 }
 0x834   :  { %2566 = vsyncpa [#allocation15], 1 }
 0x835   :  { %2567 = vsyncpa [#allocation6], 1 }
 0x836   :  { %2569 = vsyncpa [#allocation6 + $0x1], 1 }

</bundles_post_ra>
